<compile_context>
chip_gen: v7x
topology: tpu7x:2x2x1
jax: 0.10.0
libtpu: 0.0.40
codegen_flags: <defaults>
</compile_context>

<pallas_src>
import jax
import jax.numpy as jnp
from jax.experimental import pallas as pl
from jax.experimental.pallas import tpu as pltpu


def _round_up(v, m):
    return ((v + m - 1) // m) * m


def _mlp_kernel(x_ref, w1_ref, b1_ref, w2_ref, b2_ref, w3_ref, b3_ref, o_ref):
    # fc1: (TB, K) @ (K, H). x arrives f32; cast to bf16 in-kernel (VPU has
    # slack), MXU matmul with f32 accumulation; bias-add + ReLU stay in f32.
    h = jnp.dot(x_ref[...].astype(jnp.bfloat16), w1_ref[...],
                preferred_element_type=jnp.float32)
    h = jnp.maximum(h + b1_ref[...], 0.0)
    # fc2: (TB, H) @ (H, H)
    h = jnp.dot(h.astype(jnp.bfloat16), w2_ref[...],
                preferred_element_type=jnp.float32)
    h = jnp.maximum(h + b2_ref[...], 0.0)
    # fc3: (TB, H) @ (H, N_pad) -- lane-dense (128-wide) output store.
    out = jnp.dot(h.astype(jnp.bfloat16), w3_ref[...],
                  preferred_element_type=jnp.float32)
    o_ref[...] = (out + b3_ref[...]).astype(o_ref.dtype)


def prepare_params(params):
    """One-time conversion of f32 (in, out) weights to TPU-friendly form.

    Call once at init; reuse the result for every forward call so the static
    pad/cast work is not repeated per call.
    """
    w1, b1 = params["w1"], params["b1"]
    w2, b2 = params["w2"], params["b2"]
    w3, b3 = params["w3"], params["b3"]
    out_dim = w3.shape[1]
    n_pad = _round_up(out_dim, 128)          # 26 -> 128 (lane-dense output)
    return {
        "w1": w1.astype(jnp.bfloat16),                                   # (K, H), K stays 617
        "w2": w2.astype(jnp.bfloat16),                                   # (H, H)
        "w3": jnp.pad(w3.astype(jnp.bfloat16), ((0, 0), (0, n_pad - out_dim))),
        "b1": b1.reshape(1, -1).astype(jnp.float32),
        "b2": b2.reshape(1, -1).astype(jnp.float32),
        "b3": jnp.pad(b3.reshape(1, -1).astype(jnp.float32),
                      ((0, 0), (0, n_pad - out_dim))),
        "out_dim": out_dim,
    }


def _pick_batch_tile(B, tile_b):
    """Batch tile: multiple of 16; >= 2 grid steps when the batch allows it."""
    b16 = _round_up(max(B, 1), 16)
    tb = min(_round_up(tile_b, 16), b16)
    if b16 > 16:
        # Cap so the grid has at least 2 steps -> both v7x TensorCores get work.
        tb = min(tb, _round_up(-(-b16 // 2), 16))
    return max(16, tb)


def mlp_forward(x, prep, *, tile_b=512):
    """x: (B, input_dim) float32. prep: output of prepare_params()."""
    w1, b1 = prep["w1"], prep["b1"]
    w2, b2 = prep["w2"], prep["b2"]
    w3, b3 = prep["w3"], prep["b3"]
    out_dim = prep["out_dim"]

    B, in_dim = x.shape
    hid = w1.shape[1]
    n_pad = w3.shape[1]

    tb = _pick_batch_tile(B, tile_b)
    b_pad = _round_up(B, tb)

    # Only the batch axis may need padding; K is left at its natural size and
    # no dtype cast of activations happens in the wrapper.
    xp = x if b_pad == B else jnp.pad(x, ((0, b_pad - B), (0, 0)))

    resident = lambda i: (0, 0)   # constant index_map -> fetched once, VMEM-resident

    def res_spec(shape):
        return pl.BlockSpec(shape, resident, pipeline_mode=pl.Buffered(1))

    out = pl.pallas_call(
        _mlp_kernel,
        out_shape=jax.ShapeDtypeStruct((b_pad, n_pad), jnp.float32),
        grid=(b_pad // tb,),
        in_specs=[
            pl.BlockSpec((tb, in_dim), lambda i: (i, 0)),   # x tile (f32, pipelined)
            res_spec((in_dim, hid)),                        # w1 (bf16)
            res_spec((1, hid)),                             # b1 (f32)
            res_spec((hid, hid)),                           # w2 (bf16)
            res_spec((1, hid)),                             # b2 (f32)
            res_spec((hid, n_pad)),                         # w3 (bf16)
            res_spec((1, n_pad)),                           # b3 (f32)
        ],
        out_specs=pl.BlockSpec((tb, n_pad), lambda i: (i, 0)),
        compiler_params=pltpu.CompilerParams(
            dimension_semantics=("parallel",),              # batch tiles -> both TCs on v7x
            vmem_limit_bytes=(32 << 20) if tb > 256 else (16 << 20),
        ),
    )(xp, w1, b1, w2, b2, w3, b3)

    # Slice padded batch / output lanes back to the logical result.
    return out[:B, :out_dim].astype(x.dtype)


def init_params(key, input_dim=617, hidden_dim=512, output_dim=26):
    """Deterministic init mirroring nn.Linear's U(-1/sqrt(fan_in), 1/sqrt(fan_in))."""
    def linear(k, fan_in, fan_out):
        kw, kb = jax.random.split(k)
        bound = 1.0 / jnp.sqrt(fan_in)
        # stored as (in, out) so forward is x @ W + b
        w = jax.random.uniform(kw, (fan_in, fan_out), jnp.float32, -bound, bound)
        b = jax.random.uniform(kb, (fan_out,), jnp.float32, -bound, bound)
        return w, b

    k1, k2, k3 = jax.random.split(key, 3)
    w1, b1 = linear(k1, input_dim, hidden_dim)
    w2, b2 = linear(k2, hidden_dim, hidden_dim)
    w3, b3 = linear(k3, hidden_dim, output_dim)
    return {"w1": w1, "b1": b1, "w2": w2, "b2": b2, "w3": w3, "b3": b3}


def mlp_reference(x, p):
    h = jnp.maximum(x @ p["w1"] + p["b1"], 0.0)
    h = jnp.maximum(h @ p["w2"] + p["b2"], 0.0)
    return h @ p["w3"] + p["b3"]


if __name__ == "__main__":
    key = jax.random.PRNGKey(0)
    kp, kx = jax.random.split(key)

    INPUT_DIM, HIDDEN_DIM, OUTPUT_DIM, BATCH = 617, 512, 26, 2
    params = init_params(kp, INPUT_DIM, HIDDEN_DIM, OUTPUT_DIM)
    prep = prepare_params(params)          # one-time weight pad/cast (cached)
    x = jax.random.normal(kx, (BATCH, INPUT_DIM), jnp.float32)

    out = jax.block_until_ready(mlp_forward(x, prep))

    ref = mlp_reference(x, params)
    assert out.shape == (BATCH, OUTPUT_DIM), out.shape
    # bf16 matmul operands (f32 accumulate) vs f32 reference -> loosened tolerance.
    max_err = float(jnp.max(jnp.abs(out - ref)))
    assert jnp.allclose(out, ref, atol=5e-2, rtol=5e-2), f"mismatch vs reference, max_err={max_err}"

    print("KERNEL_OK")
</pallas_src>

<mosaic_0001>
module attributes {stable_mosaic.version = 11 : i64} {
  func.func @_mlp_kernel(%arg0: i32, %arg1: memref<16x617xf32, #tpu.memory_space<vmem>>, %arg2: memref<617x512xbf16, #tpu.memory_space<vmem>>, %arg3: memref<1x512xf32, #tpu.memory_space<vmem>>, %arg4: memref<512x512xbf16, #tpu.memory_space<vmem>>, %arg5: memref<1x512xf32, #tpu.memory_space<vmem>>, %arg6: memref<512x128xbf16, #tpu.memory_space<vmem>>, %arg7: memref<1x128xf32, #tpu.memory_space<vmem>>, %arg8: memref<16x128xf32, #tpu.memory_space<vmem>>) attributes {dimension_semantics = [#tpu.dimension_semantics<parallel>], iteration_bounds = array<i64: 1>, scalar_prefetch = 0 : i64, scratch_operands = 0 : i64, tpu.core_type = #tpu.core_type<tc>, window_params = [{transform_indices = @transform_0, window_bounds = array<i64: 16, 617>}, {pipeline_mode = #tpu.pipeline_mode<synchronous>, transform_indices = @transform_1, window_bounds = array<i64: 617, 512>}, {pipeline_mode = #tpu.pipeline_mode<synchronous>, transform_indices = @transform_2, window_bounds = array<i64: 1, 512>}, {pipeline_mode = #tpu.pipeline_mode<synchronous>, transform_indices = @transform_3, window_bounds = array<i64: 512, 512>}, {pipeline_mode = #tpu.pipeline_mode<synchronous>, transform_indices = @transform_4, window_bounds = array<i64: 1, 512>}, {pipeline_mode = #tpu.pipeline_mode<synchronous>, transform_indices = @transform_5, window_bounds = array<i64: 512, 128>}, {pipeline_mode = #tpu.pipeline_mode<synchronous>, transform_indices = @transform_6, window_bounds = array<i64: 1, 128>}, {transform_indices = @transform_7, window_bounds = array<i64: 16, 128>}]} {
    %c0 = arith.constant 0 : index
    %c0_0 = arith.constant 0 : index
    %0 = vector.load %arg1[%c0, %c0_0] : memref<16x617xf32, #tpu.memory_space<vmem>>, vector<16x617xf32>
    %1 = arith.truncf %0 : vector<16x617xf32> to vector<16x617xbf16>
    %c0_1 = arith.constant 0 : index
    %c0_2 = arith.constant 0 : index
    %2 = vector.load %arg2[%c0_1, %c0_2] : memref<617x512xbf16, #tpu.memory_space<vmem>>, vector<617x512xbf16>
    %cst = arith.constant dense<0.000000e+00> : vector<16x512xf32>
    %3 = tpu.matmul %1, %2, %cst {dimension_numbers = #tpu.dot_dimension_numbers<[1], [0], [0], [1], [0, 0, 1, 1], [], []>} : vector<16x617xbf16>, vector<617x512xbf16>, vector<16x512xf32> -> vector<16x512xf32>
    %c0_3 = arith.constant 0 : index
    %c0_4 = arith.constant 0 : index
    %4 = vector.load %arg3[%c0_3, %c0_4] : memref<1x512xf32, #tpu.memory_space<vmem>>, vector<1x512xf32>
    %5 = vector.broadcast %4 : vector<1x512xf32> to vector<16x512xf32>
    %6 = arith.addf %3, %5 : vector<16x512xf32>
    %cst_5 = arith.constant 0.000000e+00 : f32
    %7 = vector.broadcast %cst_5 : f32 to vector<16x512xf32>
    %8 = arith.maximumf %6, %7 : vector<16x512xf32>
    %9 = arith.truncf %8 : vector<16x512xf32> to vector<16x512xbf16>
    %c0_6 = arith.constant 0 : index
    %c0_7 = arith.constant 0 : index
    %10 = vector.load %arg4[%c0_6, %c0_7] : memref<512x512xbf16, #tpu.memory_space<vmem>>, vector<512x512xbf16>
    %cst_8 = arith.constant dense<0.000000e+00> : vector<16x512xf32>
    %11 = tpu.matmul %9, %10, %cst_8 {dimension_numbers = #tpu.dot_dimension_numbers<[1], [0], [0], [1], [0, 0, 1, 1], [], []>} : vector<16x512xbf16>, vector<512x512xbf16>, vector<16x512xf32> -> vector<16x512xf32>
    %c0_9 = arith.constant 0 : index
    %c0_10 = arith.constant 0 : index
    %12 = vector.load %arg5[%c0_9, %c0_10] : memref<1x512xf32, #tpu.memory_space<vmem>>, vector<1x512xf32>
    %13 = vector.broadcast %12 : vector<1x512xf32> to vector<16x512xf32>
    %14 = arith.addf %11, %13 : vector<16x512xf32>
    %cst_11 = arith.constant 0.000000e+00 : f32
    %15 = vector.broadcast %cst_11 : f32 to vector<16x512xf32>
    %16 = arith.maximumf %14, %15 : vector<16x512xf32>
    %17 = arith.truncf %16 : vector<16x512xf32> to vector<16x512xbf16>
    %c0_12 = arith.constant 0 : index
    %c0_13 = arith.constant 0 : index
    %18 = vector.load %arg6[%c0_12, %c0_13] : memref<512x128xbf16, #tpu.memory_space<vmem>>, vector<512x128xbf16>
    %cst_14 = arith.constant dense<0.000000e+00> : vector<16x128xf32>
    %19 = tpu.matmul %17, %18, %cst_14 {dimension_numbers = #tpu.dot_dimension_numbers<[1], [0], [0], [1], [0, 0, 1, 1], [], []>} : vector<16x512xbf16>, vector<512x128xbf16>, vector<16x128xf32> -> vector<16x128xf32>
    %c0_15 = arith.constant 0 : index
    %c0_16 = arith.constant 0 : index
    %20 = vector.load %arg7[%c0_15, %c0_16] : memref<1x128xf32, #tpu.memory_space<vmem>>, vector<1x128xf32>
    %21 = vector.broadcast %20 : vector<1x128xf32> to vector<16x128xf32>
    %22 = arith.addf %19, %21 : vector<16x128xf32>
    %c0_17 = arith.constant 0 : index
    %c0_18 = arith.constant 0 : index
    %23 = vector.load %arg8[%c0_17, %c0_18] : memref<16x128xf32, #tpu.memory_space<vmem>>, vector<16x128xf32>
    tpu.vector_store %arg8[%c0_17, %c0_18], %22 {strides = array<i32>} : memref<16x128xf32, #tpu.memory_space<vmem>>, vector<16x128xf32>,
    return
  }
  func.func @transform_0(%arg0: i32) -> (i32, i32) {
    %c0_i32 = arith.constant 0 : i32
    %c0_i32_0 = arith.constant 0 : i32
    return %arg0, %c0_i32 : i32, i32
  }
  func.func @transform_1(%arg0: i32) -> (i32, i32) {
    %c0_i32 = arith.constant 0 : i32
    %c0_i32_0 = arith.constant 0 : i32
    %c0_i32_1 = arith.constant 0 : i32
    return %c0_i32, %c0_i32_0 : i32, i32
  }
  func.func @transform_2(%arg0: i32) -> (i32, i32) {
    %c0_i32 = arith.constant 0 : i32
    %c0_i32_0 = arith.constant 0 : i32
    %c0_i32_1 = arith.constant 0 : i32
    return %c0_i32, %c0_i32_0 : i32, i32
  }
  func.func @transform_3(%arg0: i32) -> (i32, i32) {
    %c0_i32 = arith.constant 0 : i32
    %c0_i32_0 = arith.constant 0 : i32
    %c0_i32_1 = arith.constant 0 : i32
    return %c0_i32, %c0_i32_0 : i32, i32
  }
  func.func @transform_4(%arg0: i32) -> (i32, i32) {
    %c0_i32 = arith.constant 0 : i32
    %c0_i32_0 = arith.constant 0 : i32
    %c0_i32_1 = arith.constant 0 : i32
    return %c0_i32, %c0_i32_0 : i32, i32
  }
  func.func @transform_5(%arg0: i32) -> (i32, i32) {
    %c0_i32 = arith.constant 0 : i32
    %c0_i32_0 = arith.constant 0 : i32
    %c0_i32_1 = arith.constant 0 : i32
    return %c0_i32, %c0_i32_0 : i32, i32
  }
  func.func @transform_6(%arg0: i32) -> (i32, i32) {
    %c0_i32 = arith.constant 0 : i32
    %c0_i32_0 = arith.constant 0 : i32
    %c0_i32_1 = arith.constant 0 : i32
    return %c0_i32, %c0_i32_0 : i32, i32
  }
  func.func @transform_7(%arg0: i32) -> (i32, i32) {
    %c0_i32 = arith.constant 0 : i32
    %c0_i32_0 = arith.constant 0 : i32
    return %arg0, %c0_i32 : i32, i32
  }
}

</mosaic_0001>

<bundles_post_ra>
// kernel: tpu_custom_call.1
= control target key start
LH: loop header
LB: loop body
LE: loop exit
PB: predicated region body
PF: predicated region fallthrough
CT: control target
= control target key end

     0   :  { %12 = vsyncpa [#allocation3], 0  ;;  %s3839_s0 = inlined_call_operand.hbm [shape: f32[16,617], index: 0, kind: input, shape index: {}]   ;;  %s3840_s1 = inlined_call_operand.hbm [shape: bf16[617,512], index: 1, kind: input, shape index: {}]   ;;  %s3841_s2 = inlined_call_operand.vmem [shape: f32[1,512], index: 2, kind: input, shape index: {}]   ;;  %s3842_s3 = inlined_call_operand.hbm [shape: bf16[512,512], index: 3, kind: input, shape index: {}]   ;;  %s3843_s4 = inlined_call_operand.vmem [shape: f32[1,512], index: 4, kind: input, shape index: {}]   ;;  %s3844_s5 = inlined_call_operand.hbm [shape: bf16[512,128], index: 5, kind: input, shape index: {}]   ;;  %s3845_s6 = inlined_call_operand.vmem [shape: f32[1,128], index: 6, kind: input, shape index: {}]   ;;  %s3846_s7 = inlined_call_operand.hbm [shape: f32[16,128], index: 7, kind: output, shape index: {}]  }
   0x1   :  { %13 = vsyncpa [#allocation6], 0 }
   0x2   :  { %14 = vsyncpa [#allocation9], 0 }
   0x3   :  { %15 = vsyncpa [#allocation4], 0  ;;  %s3676_s24 = smov [#allocation5]   ;;  %s3558_s28 = scalar_lea.hbm %s3840_s1, 19968 }
   0x4   :  { %s33_s25 = sshll.u32 %s3676_s24, 4  ;;  %p3559_p0 = scmp.ne.s32.totalorder %s3840_s1, %s3558_s28  ;;  %s34_s25 = int_to_ptr.vmem [resolvable:$true] %s33_s25 }
   0x5   :  { %p3562_p1 = scmp.lt.u32.totalorder %s3558_s28, %s3840_s1 }
   0x7   :  { %p3564_p2 = pnand %p3562_p1, %p3559_p0 }
   0x9   :  { %3567 = shalt.err (!%p3564_p2)
}
   0xa   :  { %s3568_s10 = scalar_lea.vmem %s34_s25, 19968  ;;  %p3573_p4 = scmp.lt.s32.totalorder %s34_s25, %s34_s25 }
   0xb   :  { %p3569_p3 = scmp.ne.s32.totalorder %s34_s25, %s3568_s10  ;;  %p3574_p5 = scmp.lt.s32.totalorder %s3568_s10, %s3568_s10 }
   0xd   :  { %p3575_p6 = por %p3574_p5, %p3573_p4 }
   0xf   :  { %p3576_p7 = pnand %p3575_p6, %p3569_p3 }
  0x11   :  { %3579 = shalt.err (!%p3576_p7)
}
  0x12   :  { %s3677_s11 = smov 256   ;;  %s3678_s12 = smov 16  }
  0x13   :  { %39 = dma.hbm_to_vmem [thread:$0]  %s3840_s1, 19968, %s34_s25, [#allocation6], %s3677_s11, %s3677_s11, %s3678_s12  }
  0x14   :  { %s3679_s15 = smov [#allocation2]   ;;  %s3580_s19 = scalar_lea.hbm %s3839_s0, 1280 }
  0x15   :  { %s21_s16 = sshll.u32 %s3679_s15, 4  ;;  %p3581_p8 = scmp.ne.s32.totalorder %s3839_s0, %s3580_s19  ;;  %s22_s16 = int_to_ptr.vmem [resolvable:$true] %s21_s16 }
  0x16   :  { %p3584_p9 = scmp.lt.u32.totalorder %s3580_s19, %s3839_s0 }
  0x18   :  { %p3586_p10 = pnand %p3584_p9, %p3581_p8 }
  0x1a   :  { %3589 = shalt.err (!%p3586_p10)
}
  0x1b   :  { %s3590_s24 = scalar_lea.vmem %s22_s16, 1280  ;;  %p3595_p12 = scmp.lt.s32.totalorder %s22_s16, %s22_s16 }
  0x1c   :  { %p3591_p11 = scmp.ne.s32.totalorder %s22_s16, %s3590_s24  ;;  %p3596_p13 = scmp.lt.s32.totalorder %s3590_s24, %s3590_s24 }
  0x1e   :  { %p3597_p0 = por %p3596_p13, %p3595_p12 }
  0x20   :  { %p3598_p1 = pnand %p3597_p0, %p3591_p11 }
  0x22   :  { %3601 = shalt.err (!%p3598_p1)
}
  0x23   :  { %s3680_s1 = smov 640   ;;  %s3681_s25 = smov 40  }
  0x24   :  { %27 = dma.hbm_to_vmem [thread:$0]  %s3839_s0, 1280, %s22_s16, [#allocation3], %s3680_s1, %s3680_s1, %s3681_s25  }
  0x25   :  { %s3682_s28 = smov [#allocation7]   ;;  %s3683_s30 = smov [#allocation8]  }
  0x26   :  { %s47_s29 = sshll.u32 %s3682_s28, 4  ;;  %s61_s8 = sshll.u32 %s3683_s30, 4  ;;  %s48_s29 = int_to_ptr.vmem [resolvable:$true] %s47_s29  ;;  %s3758_s8 = int_to_ptr.vmem [resolvable:$true] %s61_s8 }
  0x27   :  { %s3602_s13 = scalar_lea.hbm %s3842_s3, 16384 }
  0x28   :  { %p3603_p2 = scmp.ne.s32.totalorder %s3842_s3, %s3602_s13  ;;  %p3606_p3 = scmp.lt.u32.totalorder %s3602_s13, %s3842_s3 }
  0x2a   :  { %p3608_p4 = pnand %p3606_p3, %p3603_p2 }
  0x2c   :  { %3611 = shalt.err (!%p3608_p4)
}
  0x2d   :  { %s3612_s0 = scalar_lea.vmem %s48_s29, 16384  ;;  %p3617_p6 = scmp.lt.s32.totalorder %s48_s29, %s48_s29 }
  0x2e   :  { %p3613_p5 = scmp.ne.s32.totalorder %s48_s29, %s3612_s0  ;;  %p3618_p7 = scmp.lt.s32.totalorder %s3612_s0, %s3612_s0 }
  0x30   :  { %p3619_p8 = por %p3618_p7, %p3617_p6 }
  0x32   :  { %p3620_p9 = pnand %p3619_p8, %p3613_p5 }
  0x34   :  { %3623 = shalt.err (!%p3620_p9)
}
  0x35   :  { %53 = dma.hbm_to_vmem [thread:$0]  %s3842_s3, 16384, %s48_s29, [#allocation6], %s3677_s11, %s3677_s11, %s3678_s12  }
  0x36   :  { %s3624_s22 = scalar_lea.hbm %s3844_s5, 4096 }
  0x37   :  { %p3625_p10 = scmp.ne.s32.totalorder %s3844_s5, %s3624_s22  ;;  %p3628_p11 = scmp.lt.u32.totalorder %s3624_s22, %s3844_s5 }
  0x39   :  { %p3630_p12 = pnand %p3628_p11, %p3625_p10 }
  0x3b   :  { %3633 = shalt.err (!%p3630_p12)
}
  0x3c   :  { %s3634_s26 = scalar_lea.vmem %s3758_s8, 4096  ;;  %p3639_p0 = scmp.lt.s32.totalorder %s3758_s8, %s3758_s8 }
  0x3d   :  { %p3635_p13 = scmp.ne.s32.totalorder %s3758_s8, %s3634_s26  ;;  %p3640_p1 = scmp.lt.s32.totalorder %s3634_s26, %s3634_s26 }
  0x3f   :  { %p3641_p2 = por %p3640_p1, %p3639_p0 }
  0x41   :  { %p3642_p3 = pnand %p3641_p2, %p3635_p13 }
  0x43   :  { %3645 = shalt.err (!%p3642_p3)
}
  0x44   :  { %s3684_s3 = smov 64   ;;  %s3685_s11 = smov 4  }
  0x45   :  { %67 = dma.hbm_to_vmem [thread:$0]  %s3844_s5, 4096, %s3758_s8, [#allocation9], %s3684_s3, %s3684_s3, %s3685_s11  }
  0x46   :  { %3668 = dma.done.wait [#allocation3], 1280  }
  0x47   :  { %3669 = vsyncadd [#allocation3], 4294966016 }
  0x48   :  { %3670 = dma.done.wait [#allocation6], 36352  }
  0x49   :  { %3671 = vsyncadd [#allocation6], 4294930944 }
  0x4a   :  { %3672 = dma.done.wait [#allocation9], 4096  }
  0x4b   :  { %3673 = vsyncadd [#allocation9], 4294963200  ;;  %v3100_v0 = vld [vmem:[#allocation5 + $0x4] ss:$16 sps:$4 sm:$0xff]   ;;  %v3102_v1 = vld [vmem:[#allocation5 + $0xc] ss:$16 sps:$4 sm:$0xff]  }
  0x4c   :  { %1072 = vmatprep.subr.bf16.mxu0 %v3100_v0  ;;  %v3104_v2 = vld [vmem:[#allocation5] ss:$16 sps:$4 sm:$0xff]   ;;  %v3105_v3 = vld [vmem:[#allocation5 + $0x8] ss:$16 sps:$4 sm:$0xff]   ;;  %1201 = vmatprep.subr.bf16.mxu1 %v3102_v1  ;;  %v3106_v4 = vld [vmem:[#allocation5 + $0x24] ss:$16 sps:$4 sm:$0xff]  }
  0x4d   :  { %1073 = vmatpush1.bf16.msra.mxu0 %v3104_v2  ;;  %1202 = vmatpush1.bf16.msra.mxu1 %v3105_v3  ;;  %v3108_v5 = vld [vmem:[#allocation5 + $0x2c] ss:$16 sps:$4 sm:$0xff]   ;;  %v3110_v6 = vld [vmem:[#allocation5 + $0x20] ss:$16 sps:$4 sm:$0xff]   ;;  %v3111_v7 = vld [vmem:[#allocation5 + $0x28] ss:$16 sps:$4 sm:$0xff]  }
  0x4e   :  { %1074 = vmatprep.subr.bf16.mxu0 %v3106_v4  ;;  %1203 = vmatprep.subr.bf16.mxu1 %v3108_v5  ;;  %v3112_v8 = vld [vmem:[#allocation5 + $0x44] ss:$16 sps:$4 sm:$0xff]   ;;  %v3114_v9 = vld [vmem:[#allocation5 + $0x4c] ss:$16 sps:$4 sm:$0xff]   ;;  %v3116_v10 = vld [vmem:[#allocation5 + $0x40] ss:$16 sps:$4 sm:$0xff]  }
  0x4f   :  { %v3117_v11 = vld [vmem:[#allocation5 + $0x48] ss:$16 sps:$4 sm:$0xff]   ;;  %v3118_v12 = vld [vmem:[#allocation5 + $0x64] ss:$16 sps:$4 sm:$0xff]   ;;  %v3120_v13 = vld [vmem:[#allocation5 + $0x6c] ss:$16 sps:$4 sm:$0xff]  }
  0x50   :  { %v3122_v14 = vld [vmem:[#allocation5 + $0x60] ss:$16 sps:$4 sm:$0xff]   ;;  %v3123_v15 = vld [vmem:[#allocation5 + $0x68] ss:$16 sps:$4 sm:$0xff]   ;;  %v3124_v16 = vld [vmem:[#allocation5 + $0x84] ss:$16 sps:$4 sm:$0xff]  }
  0x51   :  { %1075 = vmatpush1.bf16.msra.mxu0 %v3110_v6  ;;  %1204 = vmatpush1.bf16.msra.mxu1 %v3111_v7  ;;  %v3126_v17 = vld [vmem:[#allocation5 + $0x8c] ss:$16 sps:$4 sm:$0xff]   ;;  %v3128_v18 = vld [vmem:[#allocation5 + $0x80] ss:$16 sps:$4 sm:$0xff]   ;;  %v3129_v19 = vld [vmem:[#allocation5 + $0x88] ss:$16 sps:$4 sm:$0xff]  }
  0x52   :  { %1076 = vmatprep.subr.bf16.mxu0 %v3112_v8  ;;  %1205 = vmatprep.subr.bf16.mxu1 %v3114_v9  ;;  %v3130_v20 = vld [vmem:[#allocation5 + $0xa4] ss:$16 sps:$4 sm:$0xff]   ;;  %v3132_v21 = vld [vmem:[#allocation5 + $0xac] ss:$16 sps:$4 sm:$0xff]   ;;  %v3134_v22 = vld [vmem:[#allocation5 + $0xa0] ss:$16 sps:$4 sm:$0xff]  }
  0x53   :  { %v3135_v23 = vld [vmem:[#allocation5 + $0xa8] ss:$16 sps:$4 sm:$0xff]   ;;  %v3136_v24 = vld [vmem:[#allocation5 + $0xc4] ss:$16 sps:$4 sm:$0xff]   ;;  %v3138_v25 = vld [vmem:[#allocation5 + $0xcc] ss:$16 sps:$4 sm:$0xff]  }
  0x54   :  { %v3140_v26 = vld [vmem:[#allocation5 + $0xc0] ss:$16 sps:$4 sm:$0xff]   ;;  %v3141_v27 = vld [vmem:[#allocation5 + $0xc8] ss:$16 sps:$4 sm:$0xff]   ;;  %v3142_v28 = vld [vmem:[#allocation5 + $0xe4] ss:$16 sps:$4 sm:$0xff]  }
  0x55   :  { %1077 = vmatpush1.bf16.msra.mxu0 %v3116_v10  ;;  %1206 = vmatpush1.bf16.msra.mxu1 %v3117_v11  ;;  %v3144_v29 = vld [vmem:[#allocation5 + $0xec] ss:$16 sps:$4 sm:$0xff]   ;;  %v3146_v30 = vld [vmem:[#allocation5 + $0xe0] ss:$16 sps:$4 sm:$0xff]   ;;  %v3147_v31 = vld [vmem:[#allocation5 + $0xe8] ss:$16 sps:$4 sm:$0xff]  }
  0x56   :  { %1078 = vmatprep.subr.bf16.mxu0 %v3118_v12  ;;  %1207 = vmatprep.subr.bf16.mxu1 %v3120_v13  ;;  %v3148_v32 = vld [vmem:[#allocation5 + $0x104] ss:$16 sps:$4 sm:$0xff]   ;;  %v3150_v33 = vld [vmem:[#allocation5 + $0x10c] ss:$16 sps:$4 sm:$0xff]   ;;  %v3152_v34 = vld [vmem:[#allocation5 + $0x100] ss:$16 sps:$4 sm:$0xff]  }
  0x57   :  { %v3153_v35 = vld [vmem:[#allocation5 + $0x108] ss:$16 sps:$4 sm:$0xff]   ;;  %v3154_v36 = vld [vmem:[#allocation5 + $0x124] ss:$16 sps:$4 sm:$0xff]   ;;  %v3156_v37 = vld [vmem:[#allocation5 + $0x12c] ss:$16 sps:$4 sm:$0xff]  }
  0x58   :  { %v3158_v38 = vld [vmem:[#allocation5 + $0x120] ss:$16 sps:$4 sm:$0xff]   ;;  %v3159_v39 = vld [vmem:[#allocation5 + $0x128] ss:$16 sps:$4 sm:$0xff]   ;;  %v3160_v40 = vld [vmem:[#allocation5 + $0x144] ss:$16 sps:$4 sm:$0xff]  }
  0x59   :  { %1079 = vmatpush1.bf16.msra.mxu0 %v3122_v14  ;;  %1208 = vmatpush1.bf16.msra.mxu1 %v3123_v15  ;;  %v3162_v41 = vld [vmem:[#allocation5 + $0x14c] ss:$16 sps:$4 sm:$0xff]   ;;  %v3164_v42 = vld [vmem:[#allocation5 + $0x140] ss:$16 sps:$4 sm:$0xff]   ;;  %v3165_v43 = vld [vmem:[#allocation5 + $0x148] ss:$16 sps:$4 sm:$0xff]  }
  0x5a   :  { %1080 = vmatprep.subr.bf16.mxu0 %v3124_v16  ;;  %1209 = vmatprep.subr.bf16.mxu1 %v3126_v17  ;;  %v3166_v44 = vld [vmem:[#allocation5 + $0x164] ss:$16 sps:$4 sm:$0xff]   ;;  %v3168_v45 = vld [vmem:[#allocation5 + $0x16c] ss:$16 sps:$4 sm:$0xff]   ;;  %v3170_v48 = vld [vmem:[#allocation5 + $0x160] ss:$16 sps:$4 sm:$0xff]  }
  0x5b   :  { %v84_v46 = vld [vmem:[#allocation2 + $0x8] sm:$0xff]  ;;  %v89_v47 = vld [vmem:[#allocation2 + $0x30] sm:$0xff]  ;;  %v83_v4 = vld [vmem:[#allocation2] sm:$0xff]  ;;  %vm1056_vm0 = vcmask 1043456   ;;  %vm1057_vm1 = vcmask 1044480   ;;  %vm1052_vm2 = vcmask 859136  }
  0x5c   :  { %v3171_v49 = vld [vmem:[#allocation5 + $0x168] ss:$16 sps:$4 sm:$0xff]   ;;  %v94_v50 = vpack.c.bf16 %v89_v47, %v84_v46  ;;  %v3172_v51 = vld [vmem:[#allocation5 + $0x184] ss:$16 sps:$4 sm:$0xff]   ;;  %v3174_v52 = vld [vmem:[#allocation5 + $0x18c] ss:$16 sps:$4 sm:$0xff]  }
  0x5d   :  { %1081 = vmatpush1.bf16.msra.mxu0 %v3128_v18  ;;  %1210 = vmatpush1.bf16.msra.mxu1 %v3129_v19  ;;  %v3176_v53 = vld [vmem:[#allocation5 + $0x180] ss:$16 sps:$4 sm:$0xff]   ;;  %v3177_v54 = vld [vmem:[#allocation5 + $0x188] ss:$16 sps:$4 sm:$0xff]   ;;  %v3178_v55 = vld [vmem:[#allocation5 + $0x1a4] ss:$16 sps:$4 sm:$0xff]  }
  0x5e   :  { %1082 = vmatprep.subr.bf16.mxu0 %v3130_v20  ;;  %1211 = vmatprep.subr.bf16.mxu1 %v3132_v21  ;;  %v3180_v56 = vld [vmem:[#allocation5 + $0x1ac] ss:$16 sps:$4 sm:$0xff]   ;;  %v3182_v57 = vld [vmem:[#allocation5 + $0x1a0] ss:$16 sps:$4 sm:$0xff]   ;;  %v3183_v58 = vld [vmem:[#allocation5 + $0x1a8] ss:$16 sps:$4 sm:$0xff]  }
  0x5f   :  { %1104 = vmatprep.mubr.bf16.mxu0 %v94_v50  ;;  %1233 = vmatprep.mubr.bf16.mxu1 %v94_v50  ;;  %v3184_v59 = vld [vmem:[#allocation5 + $0x1c4] ss:$16 sps:$4 sm:$0xff]   ;;  %v3186_v60 = vld [vmem:[#allocation5 + $0x1cc] ss:$16 sps:$4 sm:$0xff]   ;;  %v3188_v61 = vld [vmem:[#allocation5 + $0x1c0] ss:$16 sps:$4 sm:$0xff]  }
  0x60   :  { %v3189_v62 = vld [vmem:[#allocation5 + $0x1c8] ss:$16 sps:$4 sm:$0xff]   ;;  %v3190_v63 = vld [vmem:[#allocation5 + $0x1e4] ss:$16 sps:$4 sm:$0xff]   ;;  %v3192_v0 = vld [vmem:[#allocation5 + $0x1ec] ss:$16 sps:$4 sm:$0xff]  }
  0x61   :  { %1083 = vmatpush1.bf16.msra.mxu0 %v3134_v22  ;;  %1212 = vmatpush1.bf16.msra.mxu1 %v3135_v23  ;;  %v3194_v1 = vld [vmem:[#allocation5 + $0x1e0] ss:$16 sps:$4 sm:$0xff]   ;;  %v3195_v2 = vld [vmem:[#allocation5 + $0x1e8] ss:$16 sps:$4 sm:$0xff]   ;;  %v3198_v3 = vld [vmem:[#allocation5 + $0x204] ss:$16 sps:$4 sm:$0xff]  }
  0x62   :  { %1084 = vmatprep.subr.bf16.mxu0 %v3136_v24  ;;  %1213 = vmatprep.subr.bf16.mxu1 %v3138_v25  ;;  %v88_v5 = vld [vmem:[#allocation2 + $0x28] sm:$0xff]  ;;  %v3196_v7 = vld [vmem:[#allocation5 + $0x200] ss:$16 sps:$4 sm:$0xff]   ;;  %v3204_v10 = vld [vmem:[#allocation5 + $0x224] ss:$16 sps:$4 sm:$0xff]   ;;  %s3688_s8 = smov [#allocation10]  }
  0x63   :  { %v3201_v6 = vld [vmem:[#allocation5 + $0x20c] ss:$16 sps:$4 sm:$0xff]   ;;  %v3199_v8 = vld [vmem:[#allocation5 + $0x208] ss:$16 sps:$4 sm:$0xff]   ;;  %v93_v9 = vpack.c.bf16 %v88_v5, %v83_v4  ;;  %v3202_v12 = vld [vmem:[#allocation5 + $0x220] ss:$16 sps:$4 sm:$0xff]  }
  0x64   :  { %v3207_v11 = vld [vmem:[#allocation5 + $0x22c] ss:$16 sps:$4 sm:$0xff]   ;;  %v3205_v13 = vld [vmem:[#allocation5 + $0x228] ss:$16 sps:$4 sm:$0xff]   ;;  %v3210_v14 = vld [vmem:[#allocation5 + $0x244] ss:$16 sps:$4 sm:$0xff]  }
  0x65   :  { %1085 = vmatpush1.bf16.msra.mxu0 %v3140_v26  ;;  %1214 = vmatpush1.bf16.msra.mxu1 %v3141_v27  ;;  %v3213_v15 = vld [vmem:[#allocation5 + $0x24c] ss:$16 sps:$4 sm:$0xff]   ;;  %v3208_v16 = vld [vmem:[#allocation5 + $0x240] ss:$16 sps:$4 sm:$0xff]   ;;  %v3211_v17 = vld [vmem:[#allocation5 + $0x248] ss:$16 sps:$4 sm:$0xff]  }
  0x66   :  { %1086 = vmatprep.subr.bf16.mxu0 %v3142_v28  ;;  %1215 = vmatprep.subr.bf16.mxu1 %v3144_v29  ;;  %v3216_v18 = vld [vmem:[#allocation5 + $0x264] ss:$16 sps:$4 sm:$0xff]   ;;  %v3219_v19 = vld [vmem:[#allocation5 + $0x26c] ss:$16 sps:$4 sm:$0xff]   ;;  %v3214_v20 = vld [vmem:[#allocation5 + $0x260] ss:$16 sps:$4 sm:$0xff]  }
  0x67   :  { %v3217_v21 = vld [vmem:[#allocation5 + $0x268] ss:$16 sps:$4 sm:$0xff]   ;;  %v3222_v22 = vld [vmem:[#allocation5 + $0x284] ss:$16 sps:$4 sm:$0xff]   ;;  %v3225_v23 = vld [vmem:[#allocation5 + $0x28c] ss:$16 sps:$4 sm:$0xff]  }
  0x68   :  { %v3220_v24 = vld [vmem:[#allocation5 + $0x280] ss:$16 sps:$4 sm:$0xff]   ;;  %v3223_v25 = vld [vmem:[#allocation5 + $0x288] ss:$16 sps:$4 sm:$0xff]   ;;  %v3228_v26 = vld [vmem:[#allocation5 + $0x2a4] ss:$16 sps:$4 sm:$0xff]  }
  0x69   :  { %1087 = vmatpush1.bf16.msra.mxu0 %v3146_v30  ;;  %1216 = vmatpush1.bf16.msra.mxu1 %v3147_v31  ;;  %v3231_v27 = vld [vmem:[#allocation5 + $0x2ac] ss:$16 sps:$4 sm:$0xff]   ;;  %v3226_v28 = vld [vmem:[#allocation5 + $0x2a0] ss:$16 sps:$4 sm:$0xff]   ;;  %v3229_v29 = vld [vmem:[#allocation5 + $0x2a8] ss:$16 sps:$4 sm:$0xff]  }
  0x6a   :  { %1088 = vmatprep.subr.bf16.mxu0 %v3148_v32  ;;  %1217 = vmatprep.subr.bf16.mxu1 %v3150_v33  ;;  %v3234_v30 = vld [vmem:[#allocation5 + $0x2c4] ss:$16 sps:$4 sm:$0xff]   ;;  %v3237_v31 = vld [vmem:[#allocation5 + $0x2cc] ss:$16 sps:$4 sm:$0xff]   ;;  %v3250_v47 = vld [vmem:[#allocation5 + $0x320] ss:$16 sps:$4 sm:$0xff]  }
  0x6b   :  { %v86_v32 = vld [vmem:[#allocation2 + $0x18] sm:$0xff]  ;;  %v91_v33 = vld [vmem:[#allocation2 + $0x40] sm:$0xff]  ;;  %s2668_s9 = sshll.u32 %s3688_s8, 4  ;;  %s2669_s9 = int_to_ptr.vmem [resolvable:$true] %s2668_s9 }
  0x6c   :  { %v3255_v46 = vld [vmem:[#allocation5 + $0x32c] ss:$16 sps:$4 sm:$0xff]   ;;  %v3283_v4 = vld [vmem:[#allocation5 + $0x3c8] ss:$16 sps:$4 sm:$0xff]   ;;  %v3288_v5 = vld [vmem:[#allocation5 + $0x3e4] ss:$16 sps:$4 sm:$0xff]   ;;  %p3651_p5 = scmp.lt.s32.totalorder %s2669_s9, %s2669_s9 }
  0x6d   :  { %1089 = vmatpush1.bf16.msra.mxu0 %v3152_v34  ;;  %1218 = vmatpush1.bf16.msra.mxu1 %v3153_v35  ;;  %v3232_v34 = vld [vmem:[#allocation5 + $0x2c0] ss:$16 sps:$4 sm:$0xff]   ;;  %v3235_v35 = vld [vmem:[#allocation5 + $0x2c8] ss:$16 sps:$4 sm:$0xff]   ;;  %v3261_v50 = vld [vmem:[#allocation5 + $0x34c] ss:$16 sps:$4 sm:$0xff]  }
  0x6e   :  { %1090 = vmatprep.subr.bf16.mxu0 %v3154_v36  ;;  %1219 = vmatprep.subr.bf16.mxu1 %v3156_v37  ;;  %v96_v36 = vpack.c.bf16 %v91_v33, %v86_v32  ;;  %v3240_v37 = vld [vmem:[#allocation5 + $0x2e4] ss:$16 sps:$4 sm:$0xff]   ;;  %v3319_v32 = vld [vmem:[#allocation5 + $0x488] ss:$16 sps:$4 sm:$0xff]  }
  0x6f   :  { %v3324_v33 = vld [vmem:[#allocation5 + $0x4a4] ss:$16 sps:$4 sm:$0xff]  }
  0x71   :  { %1091 = vmatpush1.bf16.msra.mxu0 %v3158_v38  ;;  %1220 = vmatpush1.bf16.msra.mxu1 %v3159_v39  ;;  %v3243_v38 = vld [vmem:[#allocation5 + $0x2ec] ss:$16 sps:$4 sm:$0xff]   ;;  %v3238_v39 = vld [vmem:[#allocation5 + $0x2e0] ss:$16 sps:$4 sm:$0xff]  }
  0x72   :  { %1092 = vmatprep.subr.bf16.mxu0 %v3160_v40  ;;  %1221 = vmatprep.subr.bf16.mxu1 %v3162_v41  ;;  %v3241_v40 = vld [vmem:[#allocation5 + $0x2e8] ss:$16 sps:$4 sm:$0xff]   ;;  %v3246_v41 = vld [vmem:[#allocation5 + $0x304] ss:$16 sps:$4 sm:$0xff]  }
  0x75   :  { %1093 = vmatpush1.bf16.msra.mxu0 %v3164_v42  ;;  %1222 = vmatpush1.bf16.msra.mxu1 %v3165_v43  ;;  %v3249_v42 = vld [vmem:[#allocation5 + $0x30c] ss:$16 sps:$4 sm:$0xff]   ;;  %v3244_v43 = vld [vmem:[#allocation5 + $0x300] ss:$16 sps:$4 sm:$0xff]  }
  0x76   :  { %1094 = vmatprep.subr.bf16.mxu0 %v3166_v44  ;;  %1223 = vmatprep.subr.bf16.mxu1 %v3168_v45  ;;  %v3247_v44 = vld [vmem:[#allocation5 + $0x308] ss:$16 sps:$4 sm:$0xff]   ;;  %v3252_v45 = vld [vmem:[#allocation5 + $0x324] ss:$16 sps:$4 sm:$0xff]  }
  0x79   :  { %1095 = vmatpush1.bf16.msra.mxu0 %v3170_v48  ;;  %1224 = vmatpush1.bf16.msra.mxu1 %v3171_v49  ;;  %v3253_v48 = vld [vmem:[#allocation5 + $0x328] ss:$16 sps:$4 sm:$0xff]   ;;  %v3258_v49 = vld [vmem:[#allocation5 + $0x344] ss:$16 sps:$4 sm:$0xff]  }
  0x7a   :  { %1096 = vmatprep.subr.bf16.mxu0 %v3172_v51  ;;  %1225 = vmatprep.subr.bf16.mxu1 %v3174_v52  ;;  %v3256_v51 = vld [vmem:[#allocation5 + $0x340] ss:$16 sps:$4 sm:$0xff]   ;;  %v3259_v52 = vld [vmem:[#allocation5 + $0x348] ss:$16 sps:$4 sm:$0xff]  }
  0x7d   :  { %1097 = vmatpush1.bf16.msra.mxu0 %v3176_v53  ;;  %1226 = vmatpush1.bf16.msra.mxu1 %v3177_v54  ;;  %v3264_v53 = vld [vmem:[#allocation5 + $0x364] ss:$16 sps:$4 sm:$0xff]   ;;  %v3267_v54 = vld [vmem:[#allocation5 + $0x36c] ss:$16 sps:$4 sm:$0xff]  }
  0x7e   :  { %1098 = vmatprep.subr.bf16.mxu0 %v3178_v55  ;;  %1227 = vmatprep.subr.bf16.mxu1 %v3180_v56  ;;  %v3262_v55 = vld [vmem:[#allocation5 + $0x360] ss:$16 sps:$4 sm:$0xff]   ;;  %v3265_v56 = vld [vmem:[#allocation5 + $0x368] ss:$16 sps:$4 sm:$0xff]  }
  0x81   :  { %1099 = vmatpush1.bf16.msra.mxu0 %v3182_v57  ;;  %1228 = vmatpush1.bf16.msra.mxu1 %v3183_v58  ;;  %v3270_v57 = vld [vmem:[#allocation5 + $0x384] ss:$16 sps:$4 sm:$0xff]   ;;  %v3273_v58 = vld [vmem:[#allocation5 + $0x38c] ss:$16 sps:$4 sm:$0xff]  }
  0x82   :  { %1100 = vmatprep.subr.bf16.mxu0 %v3184_v59  ;;  %1229 = vmatprep.subr.bf16.mxu1 %v3186_v60  ;;  %v3268_v59 = vld [vmem:[#allocation5 + $0x380] ss:$16 sps:$4 sm:$0xff]   ;;  %v3271_v60 = vld [vmem:[#allocation5 + $0x388] ss:$16 sps:$4 sm:$0xff]  }
  0x85   :  { %1101 = vmatpush1.bf16.msra.mxu0 %v3188_v61  ;;  %1230 = vmatpush1.bf16.msra.mxu1 %v3189_v62  ;;  %v3276_v61 = vld [vmem:[#allocation5 + $0x3a4] ss:$16 sps:$4 sm:$0xff]   ;;  %v3279_v62 = vld [vmem:[#allocation5 + $0x3ac] ss:$16 sps:$4 sm:$0xff]  }
  0x86   :  { %1102 = vmatprep.subr.bf16.mxu0 %v3190_v63  ;;  %1231 = vmatprep.subr.bf16.mxu1 %v3192_v0  ;;  %v3274_v63 = vld [vmem:[#allocation5 + $0x3a0] ss:$16 sps:$4 sm:$0xff]   ;;  %v3277_v0 = vld [vmem:[#allocation5 + $0x3a8] ss:$16 sps:$4 sm:$0xff]  }
  0x89   :  { %1103 = vmatpush1.bf16.msra.mxu0 %v3194_v1  ;;  %1232 = vmatpush1.bf16.msra.mxu1 %v3195_v2  ;;  %v3282_v1 = vld [vmem:[#allocation5 + $0x3c4] ss:$16 sps:$4 sm:$0xff]   ;;  %v3285_v2 = vld [vmem:[#allocation5 + $0x3cc] ss:$16 sps:$4 sm:$0xff]  }
  0x8a   :  { %1115 = vmatprep.subr.bf16.mxu0 %v3198_v3  ;;  %1244 = vmatprep.subr.bf16.mxu1 %v3201_v6  ;;  %v3280_v3 = vld [vmem:[#allocation5 + $0x3c0] ss:$16 sps:$4 sm:$0xff]   ;;  %v3291_v6 = vld [vmem:[#allocation5 + $0x3ec] ss:$16 sps:$4 sm:$0xff]  }
  0x8c   :  { %1105 = vmatmul.mubr.bf16.vlgmr.msra.gmra.mrb[0].mxu0 %v93_v9  ;;  %1234 = vmatmul.mubr.bf16.vlgmr.msra.gmra.mrb[0].mxu1 %v93_v9  ;;  %v3294_v9 = vld [vmem:[#allocation5 + $0x404] ss:$16 sps:$4 sm:$0xff]  }
  0x8d   :  { %1116 = vmatpush1.bf16.msra.mxu0 %v3196_v7  ;;  %1245 = vmatpush1.bf16.msra.mxu1 %v3199_v8  ;;  %v3286_v7 = vld [vmem:[#allocation5 + $0x3e0] ss:$16 sps:$4 sm:$0xff]   ;;  %v3289_v8 = vld [vmem:[#allocation5 + $0x3e8] ss:$16 sps:$4 sm:$0xff]  }
  0x8e   :  { %1117 = vmatprep.subr.bf16.mxu0 %v3204_v10  ;;  %1246 = vmatprep.subr.bf16.mxu1 %v3207_v11  ;;  %v85_v10 = vld [vmem:[#allocation2 + $0x10] sm:$0xff]  ;;  %v90_v11 = vld [vmem:[#allocation2 + $0x38] sm:$0xff] }
  0x8f   :  { %1147 = vmatprep.mubr.bf16.mxu0 %v96_v36  ;;  %1276 = vmatprep.mubr.bf16.mxu1 %v96_v36  ;;  %v3327_v36 = vld [vmem:[#allocation5 + $0x4ac] ss:$16 sps:$4 sm:$0xff]  }
  0x91   :  { %1118 = vmatpush1.bf16.msra.mxu0 %v3202_v12  ;;  %1247 = vmatpush1.bf16.msra.mxu1 %v3205_v13  ;;  %v3297_v12 = vld [vmem:[#allocation5 + $0x40c] ss:$16 sps:$4 sm:$0xff]   ;;  %v3292_v13 = vld [vmem:[#allocation5 + $0x400] ss:$16 sps:$4 sm:$0xff]  }
  0x92   :  { %1119 = vmatprep.subr.bf16.mxu0 %v3210_v14  ;;  %1248 = vmatprep.subr.bf16.mxu1 %v3213_v15  ;;  %v95_v14 = vpack.c.bf16 %v90_v11, %v85_v10  ;;  %v3295_v15 = vld [vmem:[#allocation5 + $0x408] ss:$16 sps:$4 sm:$0xff]   ;;  %v3372_v11 = vld [vmem:[#allocation7 + $0xc4] ss:$16 sps:$4 sm:$0xff]  }
  0x93   :  { %v3367_v10 = vld [vmem:[#allocation7 + $0xa8] ss:$16 sps:$4 sm:$0xff]  }
  0x95   :  { %1120 = vmatpush1.bf16.msra.mxu0 %v3208_v16  ;;  %1249 = vmatpush1.bf16.msra.mxu1 %v3211_v17  ;;  %v3300_v16 = vld [vmem:[#allocation5 + $0x424] ss:$16 sps:$4 sm:$0xff]   ;;  %v3303_v17 = vld [vmem:[#allocation5 + $0x42c] ss:$16 sps:$4 sm:$0xff]  }
  0x96   :  { %1121 = vmatprep.subr.bf16.mxu0 %v3216_v18  ;;  %1250 = vmatprep.subr.bf16.mxu1 %v3219_v19  ;;  %v3298_v18 = vld [vmem:[#allocation5 + $0x420] ss:$16 sps:$4 sm:$0xff]   ;;  %v3301_v19 = vld [vmem:[#allocation5 + $0x428] ss:$16 sps:$4 sm:$0xff]  }
  0x99   :  { %1122 = vmatpush1.bf16.msra.mxu0 %v3214_v20  ;;  %1251 = vmatpush1.bf16.msra.mxu1 %v3217_v21  ;;  %v3306_v20 = vld [vmem:[#allocation5 + $0x444] ss:$16 sps:$4 sm:$0xff]   ;;  %v3309_v21 = vld [vmem:[#allocation5 + $0x44c] ss:$16 sps:$4 sm:$0xff]  }
  0x9a   :  { %1123 = vmatprep.subr.bf16.mxu0 %v3222_v22  ;;  %1252 = vmatprep.subr.bf16.mxu1 %v3225_v23  ;;  %v3686_v22 = vmov 0   ;;  %v3304_v23 = vld [vmem:[#allocation5 + $0x440] ss:$16 sps:$4 sm:$0xff]  }
  0x9d   :  { %1124 = vmatpush1.bf16.msra.mxu0 %v3220_v24  ;;  %1253 = vmatpush1.bf16.msra.mxu1 %v3223_v25  ;;  %v3307_v24 = vld [vmem:[#allocation5 + $0x448] ss:$16 sps:$4 sm:$0xff]   ;;  %v3312_v25 = vld [vmem:[#allocation5 + $0x464] ss:$16 sps:$4 sm:$0xff]  }
  0x9e   :  { %1125 = vmatprep.subr.bf16.mxu0 %v3228_v26  ;;  %1254 = vmatprep.subr.bf16.mxu1 %v3231_v27  ;;  %v3315_v26 = vld [vmem:[#allocation5 + $0x46c] ss:$16 sps:$4 sm:$0xff]   ;;  %v3310_v27 = vld [vmem:[#allocation5 + $0x460] ss:$16 sps:$4 sm:$0xff]  }
  0xa1   :  { %1126 = vmatpush1.bf16.msra.mxu0 %v3226_v28  ;;  %1255 = vmatpush1.bf16.msra.mxu1 %v3229_v29  ;;  %v3313_v28 = vld [vmem:[#allocation5 + $0x468] ss:$16 sps:$4 sm:$0xff]   ;;  %v3318_v29 = vld [vmem:[#allocation5 + $0x484] ss:$16 sps:$4 sm:$0xff]  }
  0xa2   :  { %1127 = vmatprep.subr.bf16.mxu0 %v3234_v30  ;;  %1256 = vmatprep.subr.bf16.mxu1 %v3237_v31  ;;  %v3321_v30 = vld [vmem:[#allocation5 + $0x48c] ss:$16 sps:$4 sm:$0xff]   ;;  %v3316_v31 = vld [vmem:[#allocation5 + $0x480] ss:$16 sps:$4 sm:$0xff]  }
  0xa5   :  { %1128 = vmatpush1.bf16.msra.mxu0 %v3232_v34  ;;  %1257 = vmatpush1.bf16.msra.mxu1 %v3235_v35  ;;  %v3687_v34 = vmov 65535  }
  0xa6   :  { %1129 = vmatprep.subr.bf16.mxu0 %v3240_v37  ;;  %1258 = vmatprep.subr.bf16.mxu1 %v3243_v38  ;;  %v1058_v35 = vsel %vm1056_vm0, 4294967295, %v3687_v34  ;;  %v3330_v37 = vld [vmem:[#allocation5 + $0x4c4] ss:$16 sps:$4 sm:$0x1f]   ;;  %v3403_v34 = vld [vmem:[#allocation7 + $0x168] ss:$16 sps:$4 sm:$0xff]  }
  0xa7   :  { %v3333_v38 = vld [vmem:[#allocation5 + $0x4cc] ss:$16 sps:$4 sm:$0x1f]  }
  0xa9   :  { %1130 = vmatpush1.bf16.msra.mxu0 %v3238_v39  ;;  %1259 = vmatpush1.bf16.msra.mxu1 %v3241_v40  ;;  %v3322_v39 = vld [vmem:[#allocation5 + $0x4a0] ss:$16 sps:$4 sm:$0xff]   ;;  %v3325_v40 = vld [vmem:[#allocation5 + $0x4a8] ss:$16 sps:$4 sm:$0xff]  }
  0xaa   :  { %1131 = vmatprep.subr.bf16.mxu0 %v3246_v41  ;;  %1260 = vmatprep.subr.bf16.mxu1 %v3249_v42  ;;  %v3328_v41 = vld [vmem:[#allocation5 + $0x4c0] ss:$16 sps:$4 sm:$0x1f]   ;;  %v1059_v42 = vsel %vm1057_vm1, %v1058_v35, 0  ;;  %v3408_v35 = vld [vmem:[#allocation7 + $0x184] ss:$16 sps:$4 sm:$0xff]  }
  0xad   :  { %1132 = vmatpush1.bf16.msra.mxu0 %v3244_v43  ;;  %1261 = vmatpush1.bf16.msra.mxu1 %v3247_v44  ;;  %v3331_v43 = vld [vmem:[#allocation5 + $0x4c8] ss:$16 sps:$4 sm:$0x1f]   ;;  %v1064_v44 = vand.u32 %v3330_v37, %v1059_v42  ;;  %v3406_v37 = vld [vmem:[#allocation7 + $0x180] ss:$16 sps:$4 sm:$0xff]  }
  0xae   :  { %1133 = vmatprep.subr.bf16.mxu0 %v3252_v45  ;;  %1262 = vmatprep.subr.bf16.mxu1 %v3255_v46  ;;  %v1070_v45 = vand.u32 %v3333_v38, %v1059_v42  ;;  %v87_v46 = vld [vmem:[#allocation2 + $0x20] sm:$0xff]  ;;  %v3409_v38 = vld [vmem:[#allocation7 + $0x188] ss:$16 sps:$4 sm:$0xff]  }
  0xb1   :  { %1134 = vmatpush1.bf16.msra.mxu0 %v3250_v47  ;;  %1263 = vmatpush1.bf16.msra.mxu1 %v3253_v48  ;;  %v92_v47 = vld [vmem:[#allocation2 + $0x48] sm:$0xff]  ;;  %v3336_v48 = vld [vmem:[#allocation7 + $0x4] ss:$16 sps:$4 sm:$0xff]  }
  0xb2   :  { %1135 = vmatprep.subr.bf16.mxu0 %v3258_v49  ;;  %1264 = vmatprep.subr.bf16.mxu1 %v3261_v50  ;;  %v3339_v49 = vld [vmem:[#allocation7 + $0xc] ss:$16 sps:$4 sm:$0xff]   ;;  %v1061_v50 = vand.u32 %v3328_v41, %v1059_v42  ;;  %v3412_v41 = vld [vmem:[#allocation7 + $0x1a0] ss:$16 sps:$4 sm:$0xff]  }
  0xb5   :  { %1136 = vmatpush1.bf16.msra.mxu0 %v3256_v51  ;;  %1265 = vmatpush1.bf16.msra.mxu1 %v3259_v52  ;;  %v1067_v51 = vand.u32 %v3331_v43, %v1059_v42  ;;  %v3334_v52 = vld [vmem:[#allocation7] ss:$16 sps:$4 sm:$0xff]   ;;  %v3415_v42 = vld [vmem:[#allocation7 + $0x1a8] ss:$16 sps:$4 sm:$0xff]   ;;  %v3420_v43 = vld [vmem:[#allocation7 + $0x1c4] ss:$16 sps:$4 sm:$0xff]  }
  0xb6   :  { %1137 = vmatprep.subr.bf16.mxu0 %v3264_v53  ;;  %1266 = vmatprep.subr.bf16.mxu1 %v3267_v54  ;;  %v3337_v53 = vld [vmem:[#allocation7 + $0x8] ss:$16 sps:$4 sm:$0xff]   ;;  %v97_v54 = vpack.c.bf16 %v92_v47, %v87_v46  ;;  %v3426_v47 = vld [vmem:[#allocation7 + $0x1e4] ss:$16 sps:$4 sm:$0xff]  }
  0xb7   :  { %v3421_v46 = vld [vmem:[#allocation7 + $0x1c8] ss:$16 sps:$4 sm:$0xff]  }
  0xb9   :  { %1138 = vmatpush1.bf16.msra.mxu0 %v3262_v55  ;;  %1267 = vmatpush1.bf16.msra.mxu1 %v3265_v56  ;;  %v3342_v55 = vld [vmem:[#allocation7 + $0x24] ss:$16 sps:$4 sm:$0xff]   ;;  %v3345_v56 = vld [vmem:[#allocation7 + $0x2c] ss:$16 sps:$4 sm:$0xff]  }
  0xba   :  { %1139 = vmatprep.subr.bf16.mxu0 %v3270_v57  ;;  %1268 = vmatprep.subr.bf16.mxu1 %v3273_v58  ;;  %v3340_v57 = vld [vmem:[#allocation7 + $0x20] ss:$16 sps:$4 sm:$0xff]   ;;  %v3343_v58 = vld [vmem:[#allocation7 + $0x28] ss:$16 sps:$4 sm:$0xff]  }
  0xbd   :  { %1140 = vmatpush1.bf16.msra.mxu0 %v3268_v59  ;;  %1269 = vmatpush1.bf16.msra.mxu1 %v3271_v60  ;;  %v3348_v59 = vld [vmem:[#allocation7 + $0x44] ss:$16 sps:$4 sm:$0xff]   ;;  %v3351_v60 = vld [vmem:[#allocation7 + $0x4c] ss:$16 sps:$4 sm:$0xff]  }
  0xbe   :  { %1141 = vmatprep.subr.bf16.mxu0 %v3276_v61  ;;  %1270 = vmatprep.subr.bf16.mxu1 %v3279_v62  ;;  %v3346_v61 = vld [vmem:[#allocation7 + $0x40] ss:$16 sps:$4 sm:$0xff]   ;;  %v3349_v62 = vld [vmem:[#allocation7 + $0x48] ss:$16 sps:$4 sm:$0xff]  }
  0xc1   :  { %1142 = vmatpush1.bf16.msra.mxu0 %v3274_v63  ;;  %1271 = vmatpush1.bf16.msra.mxu1 %v3277_v0  ;;  %v3354_v63 = vld [vmem:[#allocation7 + $0x64] ss:$16 sps:$4 sm:$0xff]   ;;  %v3357_v0 = vld [vmem:[#allocation7 + $0x6c] ss:$16 sps:$4 sm:$0xff]  }
  0xc2   :  { %1143 = vmatprep.subr.bf16.mxu0 %v3282_v1  ;;  %1272 = vmatprep.subr.bf16.mxu1 %v3285_v2  ;;  %v3352_v1 = vld [vmem:[#allocation7 + $0x60] ss:$16 sps:$4 sm:$0xff]   ;;  %v3355_v2 = vld [vmem:[#allocation7 + $0x68] ss:$16 sps:$4 sm:$0xff]  }
  0xc5   :  { %1144 = vmatpush1.bf16.msra.mxu0 %v3280_v3  ;;  %1273 = vmatpush1.bf16.msra.mxu1 %v3283_v4  ;;  %v3360_v3 = vld [vmem:[#allocation7 + $0x84] ss:$16 sps:$4 sm:$0xff]   ;;  %v3363_v4 = vld [vmem:[#allocation7 + $0x8c] ss:$16 sps:$4 sm:$0xff]  }
  0xc6   :  { %1145 = vmatprep.subr.bf16.mxu0 %v3288_v5  ;;  %1274 = vmatprep.subr.bf16.mxu1 %v3291_v6  ;;  %v3358_v5 = vld [vmem:[#allocation7 + $0x80] ss:$16 sps:$4 sm:$0xff]   ;;  %v3361_v6 = vld [vmem:[#allocation7 + $0x88] ss:$16 sps:$4 sm:$0xff]  }
  0xc9   :  { %1146 = vmatpush1.bf16.msra.mxu0 %v3286_v7  ;;  %1275 = vmatpush1.bf16.msra.mxu1 %v3289_v8  ;;  %v3366_v7 = vld [vmem:[#allocation7 + $0xa4] ss:$16 sps:$4 sm:$0xff]   ;;  %v3369_v8 = vld [vmem:[#allocation7 + $0xac] ss:$16 sps:$4 sm:$0xff]  }
  0xca   :  { %1158 = vmatprep.subr.bf16.mxu0 %v3294_v9  ;;  %1287 = vmatprep.subr.bf16.mxu1 %v3297_v12  ;;  %v3364_v9 = vld [vmem:[#allocation7 + $0xa0] ss:$16 sps:$4 sm:$0xff]   ;;  %v3375_v12 = vld [vmem:[#allocation7 + $0xcc] ss:$16 sps:$4 sm:$0xff]  }
  0xcc   :  { %1148 = vmatmul.mubr.bf16.vlgmr.msra.gmra.mrb[0].mxu0 %v95_v14  ;;  %1277 = vmatmul.mubr.bf16.vlgmr.msra.gmra.mrb[0].mxu1 %v95_v14  ;;  %v3373_v14 = vld [vmem:[#allocation7 + $0xc8] ss:$16 sps:$4 sm:$0xff]  }
  0xcd   :  { %1159 = vmatpush1.bf16.msra.mxu0 %v3292_v13  ;;  %1288 = vmatpush1.bf16.msra.mxu1 %v3295_v15  ;;  %v3370_v13 = vld [vmem:[#allocation7 + $0xc0] ss:$16 sps:$4 sm:$0xff]   ;;  %v3378_v15 = vld [vmem:[#allocation7 + $0xe4] ss:$16 sps:$4 sm:$0xff]  }
  0xce   :  { %1160 = vmatprep.subr.bf16.mxu0 %v3300_v16  ;;  %1289 = vmatprep.subr.bf16.mxu1 %v3303_v17  ;;  %v3381_v16 = vld [vmem:[#allocation7 + $0xec] ss:$16 sps:$4 sm:$0xff]   ;;  %v3376_v17 = vld [vmem:[#allocation7 + $0xe0] ss:$16 sps:$4 sm:$0xff]  }
  0xcf   :  { %1190 = vmatprep.mubr.bf16.mxu0 %v3686_v22  ;;  %1319 = vmatprep.mubr.bf16.mxu1 %v3686_v22  ;;  %v3385_v22 = vld [vmem:[#allocation7 + $0x108] ss:$16 sps:$4 sm:$0xff]  }
  0xd1   :  { %1161 = vmatpush1.bf16.msra.mxu0 %v3298_v18  ;;  %1290 = vmatpush1.bf16.msra.mxu1 %v3301_v19  ;;  %v3379_v18 = vld [vmem:[#allocation7 + $0xe8] ss:$16 sps:$4 sm:$0xff]   ;;  %v3384_v19 = vld [vmem:[#allocation7 + $0x104] ss:$16 sps:$4 sm:$0xff]  }
  0xd2   :  { %1162 = vmatprep.subr.bf16.mxu0 %v3306_v20  ;;  %1291 = vmatprep.subr.bf16.mxu1 %v3309_v21  ;;  %v3387_v20 = vld [vmem:[#allocation7 + $0x10c] ss:$16 sps:$4 sm:$0xff]   ;;  %v3382_v21 = vld [vmem:[#allocation7 + $0x100] ss:$16 sps:$4 sm:$0xff]  }
  0xd5   :  { %1163 = vmatpush1.bf16.msra.mxu0 %v3304_v23  ;;  %1292 = vmatpush1.bf16.msra.mxu1 %v3307_v24  ;;  %v3390_v23 = vld [vmem:[#allocation7 + $0x124] ss:$16 sps:$4 sm:$0xff]   ;;  %v3393_v24 = vld [vmem:[#allocation7 + $0x12c] ss:$16 sps:$4 sm:$0xff]  }
  0xd6   :  { %1164 = vmatprep.subr.bf16.mxu0 %v3312_v25  ;;  %1293 = vmatprep.subr.bf16.mxu1 %v3315_v26  ;;  %v3388_v25 = vld [vmem:[#allocation7 + $0x120] ss:$16 sps:$4 sm:$0xff]   ;;  %v3391_v26 = vld [vmem:[#allocation7 + $0x128] ss:$16 sps:$4 sm:$0xff]  }
  0xd9   :  { %1165 = vmatpush1.bf16.msra.mxu0 %v3310_v27  ;;  %1294 = vmatpush1.bf16.msra.mxu1 %v3313_v28  ;;  %v3396_v27 = vld [vmem:[#allocation7 + $0x144] ss:$16 sps:$4 sm:$0xff]   ;;  %v3399_v28 = vld [vmem:[#allocation7 + $0x14c] ss:$16 sps:$4 sm:$0xff]  }
  0xda   :  { %1166 = vmatprep.subr.bf16.mxu0 %v3318_v29  ;;  %1295 = vmatprep.subr.bf16.mxu1 %v3321_v30  ;;  %v3394_v29 = vld [vmem:[#allocation7 + $0x140] ss:$16 sps:$4 sm:$0xff]   ;;  %v3397_v30 = vld [vmem:[#allocation7 + $0x148] ss:$16 sps:$4 sm:$0xff]  }
  0xdd   :  { %1167 = vmatpush1.bf16.msra.mxu0 %v3316_v31  ;;  %1296 = vmatpush1.bf16.msra.mxu1 %v3319_v32  ;;  %v3402_v31 = vld [vmem:[#allocation7 + $0x164] ss:$16 sps:$4 sm:$0xff]   ;;  %v3405_v32 = vld [vmem:[#allocation7 + $0x16c] ss:$16 sps:$4 sm:$0xff]  }
  0xde   :  { %1168 = vmatprep.subr.bf16.mxu0 %v3324_v33  ;;  %1297 = vmatprep.subr.bf16.mxu1 %v3327_v36  ;;  %v3400_v33 = vld [vmem:[#allocation7 + $0x160] ss:$16 sps:$4 sm:$0xff]   ;;  %v3411_v36 = vld [vmem:[#allocation7 + $0x18c] ss:$16 sps:$4 sm:$0xff]  }
  0xe1   :  { %1169 = vmatpush1.bf16.msra.mxu0 %v3322_v39  ;;  %1298 = vmatpush1.bf16.msra.mxu1 %v3325_v40  ;;  %v3414_v39 = vld [vmem:[#allocation7 + $0x1a4] ss:$16 sps:$4 sm:$0xff]   ;;  %v3417_v40 = vld [vmem:[#allocation7 + $0x1ac] ss:$16 sps:$4 sm:$0xff]  }
  0xe2   :  { %1170 = vmatprep.subr.bf16.mxu0 %v1064_v44  ;;  %1299 = vmatprep.subr.bf16.mxu1 %v1070_v45  ;;  %v3423_v44 = vld [vmem:[#allocation7 + $0x1cc] ss:$16 sps:$4 sm:$0xff]   ;;  %v3418_v45 = vld [vmem:[#allocation7 + $0x1c0] ss:$16 sps:$4 sm:$0xff]  }
  0xe5   :  { %1171 = vmatpush1.bf16.msra.mxu0 %v1061_v50  ;;  %1300 = vmatpush1.bf16.msra.mxu1 %v1067_v51  ;;  %v3427_v50 = vld [vmem:[#allocation7 + $0x1e8] ss:$16 sps:$4 sm:$0xff]   ;;  %v3432_v51 = vld [vmem:[#allocation7 + $0x204] ss:$16 sps:$4 sm:$0xff]  }
  0xe6   :  { %2132 = vmatprep.subr.bf16.mxu0 %v3336_v48  ;;  %2218 = vmatprep.subr.bf16.mxu1 %v3339_v49  ;;  %v3429_v48 = vld [vmem:[#allocation7 + $0x1ec] ss:$16 sps:$4 sm:$0xff]   ;;  %v3424_v49 = vld [vmem:[#allocation7 + $0x1e0] ss:$16 sps:$4 sm:$0xff]  }
  0xe8   :  { %2838 = vmatmul.mubr.msk.bf16.vlgmr.msra.gmra.mrb[0].mxu0 %vm1052_vm2, %v97_v54  ;;  %2839 = vmatmul.mubr.msk.bf16.vlgmr.msra.gmra.mrb[0].mxu1 %vm1052_vm2, %v97_v54 }
  0xe9   :  { %2133 = vmatpush1.bf16.msra.mxu0 %v3334_v52  ;;  %2219 = vmatpush1.bf16.msra.mxu1 %v3337_v53  ;;  %v3435_v52 = vld [vmem:[#allocation7 + $0x20c] ss:$16 sps:$4 sm:$0xff]   ;;  %v256_v53 = vlaneseq }
  0xea   :  { %2134 = vmatprep.subr.bf16.mxu0 %v3342_v55  ;;  %2220 = vmatprep.subr.bf16.mxu1 %v3345_v56 }
  0xeb   :  { %v3792_v54 = vshrl.u32 %v256_v53, 7  ;;  %v3469_v53 = vld [vmem:[#allocation7 + $0x2c8] ss:$16 sps:$4 sm:$0xff]  }
  0xed   :  { %2135 = vmatpush1.bf16.msra.mxu0 %v3340_v57  ;;  %2221 = vmatpush1.bf16.msra.mxu1 %v3343_v58  ;;  %v258_v55 = vsub.s32 0, %v3792_v54  ;;  %v266_v56 = vsub.s32 2, %v3792_v54  ;;  %v254_v57 = vld [vmem:[%s3841_s2] sm:$0xf]  ;;  %v262_v58 = vsub.s32 1, %v3792_v54 }
  0xee   :  { %2136 = vmatprep.subr.bf16.mxu0 %v3348_v59  ;;  %2222 = vmatprep.subr.bf16.mxu1 %v3351_v60  ;;  %v270_v59 = vsub.s32 3, %v3792_v54 }
  0xef   :  { %v259_v60 = vrot.slane %v254_v57, %v258_v55 }
  0xf1   :  { %2137 = vmatpush1.bf16.msra.mxu0 %v3346_v61  ;;  %2223 = vmatpush1.bf16.msra.mxu1 %v3349_v62  ;;  %v267_v61 = vrot.slane %v254_v57, %v266_v56  ;;  %v263_v62 = vrot.slane %v254_v57, %v262_v58 }
  0xf2   :  { %2138 = vmatprep.subr.bf16.mxu0 %v3354_v63  ;;  %2224 = vmatprep.subr.bf16.mxu1 %v3357_v0  ;;  %v271_v63 = vrot.slane %v254_v57, %v270_v59  ;;  %v3474_v57 = vld [vmem:[#allocation7 + $0x2e4] ss:$16 sps:$4 sm:$0xff]  }
  0xf5   :  { %2139 = vmatpush1.bf16.msra.mxu0 %v3352_v1  ;;  %2225 = vmatpush1.bf16.msra.mxu1 %v3355_v2 }
  0xf6   :  { %2140 = vmatprep.subr.bf16.mxu0 %v3360_v3  ;;  %2226 = vmatprep.subr.bf16.mxu1 %v3363_v4 }
  0xf9   :  { %2141 = vmatpush1.bf16.msra.mxu0 %v3358_v5  ;;  %2227 = vmatpush1.bf16.msra.mxu1 %v3361_v6 }
  0xfa   :  { %2142 = vmatprep.subr.bf16.mxu0 %v3366_v7  ;;  %2228 = vmatprep.subr.bf16.mxu1 %v3369_v8 }
  0xfd   :  { %2143 = vmatpush1.bf16.msra.mxu0 %v3364_v9  ;;  %2229 = vmatpush1.bf16.msra.mxu1 %v3367_v10 }
  0xfe   :  { %2144 = vmatprep.subr.bf16.mxu0 %v3372_v11  ;;  %2230 = vmatprep.subr.bf16.mxu1 %v3375_v12 }
 0x101   :  { %2145 = vmatpush1.bf16.msra.mxu0 %v3370_v13  ;;  %2231 = vmatpush1.bf16.msra.mxu1 %v3373_v14 }
 0x102   :  { %2146 = vmatprep.subr.bf16.mxu0 %v3378_v15  ;;  %2232 = vmatprep.subr.bf16.mxu1 %v3381_v16 }
 0x105   :  { %2147 = vmatpush1.bf16.msra.mxu0 %v3376_v17  ;;  %2233 = vmatpush1.bf16.msra.mxu1 %v3379_v18 }
 0x106   :  { %2148 = vmatprep.subr.bf16.mxu0 %v3384_v19  ;;  %2234 = vmatprep.subr.bf16.mxu1 %v3387_v20 }
 0x109   :  { %2149 = vmatpush1.bf16.msra.mxu0 %v3382_v21  ;;  %2235 = vmatpush1.bf16.msra.mxu1 %v3385_v22 }
 0x10a   :  { %2150 = vmatprep.subr.bf16.mxu0 %v3390_v23  ;;  %2236 = vmatprep.subr.bf16.mxu1 %v3393_v24 }
 0x10d   :  { %2151 = vmatpush1.bf16.msra.mxu0 %v3388_v25  ;;  %2237 = vmatpush1.bf16.msra.mxu1 %v3391_v26 }
 0x10e   :  { %2152 = vmatprep.subr.bf16.mxu0 %v3396_v27  ;;  %2238 = vmatprep.subr.bf16.mxu1 %v3399_v28  ;;  %v3430_v28 = vld [vmem:[#allocation7 + $0x200] ss:$16 sps:$4 sm:$0xff]  }
 0x111   :  { %2153 = vmatpush1.bf16.msra.mxu0 %v3394_v29  ;;  %2239 = vmatpush1.bf16.msra.mxu1 %v3397_v30  ;;  %v3433_v29 = vld [vmem:[#allocation7 + $0x208] ss:$16 sps:$4 sm:$0xff]   ;;  %v3438_v30 = vld [vmem:[#allocation7 + $0x224] ss:$16 sps:$4 sm:$0xff]  }
 0x112   :  { %2154 = vmatprep.subr.bf16.mxu0 %v3402_v31  ;;  %2240 = vmatprep.subr.bf16.mxu1 %v3405_v32  ;;  %v3441_v31 = vld [vmem:[#allocation7 + $0x22c] ss:$16 sps:$4 sm:$0xff]   ;;  %v3436_v32 = vld [vmem:[#allocation7 + $0x220] ss:$16 sps:$4 sm:$0xff]  }
 0x115   :  { %2155 = vmatpush1.bf16.msra.mxu0 %v3400_v33  ;;  %2241 = vmatpush1.bf16.msra.mxu1 %v3403_v34  ;;  %v3439_v33 = vld [vmem:[#allocation7 + $0x228] ss:$16 sps:$4 sm:$0xff]   ;;  %v3444_v34 = vld [vmem:[#allocation7 + $0x244] ss:$16 sps:$4 sm:$0xff]  }
 0x116   :  { %2156 = vmatprep.subr.bf16.mxu0 %v3408_v35  ;;  %2242 = vmatprep.subr.bf16.mxu1 %v3411_v36  ;;  %v3447_v35 = vld [vmem:[#allocation7 + $0x24c] ss:$16 sps:$4 sm:$0xff]   ;;  %v3442_v36 = vld [vmem:[#allocation7 + $0x240] ss:$16 sps:$4 sm:$0xff]  }
 0x119   :  { %2157 = vmatpush1.bf16.msra.mxu0 %v3406_v37  ;;  %2243 = vmatpush1.bf16.msra.mxu1 %v3409_v38  ;;  %v3445_v37 = vld [vmem:[#allocation7 + $0x248] ss:$16 sps:$4 sm:$0xff]   ;;  %v3450_v38 = vld [vmem:[#allocation7 + $0x264] ss:$16 sps:$4 sm:$0xff]  }
 0x11a   :  { %2158 = vmatprep.subr.bf16.mxu0 %v3414_v39  ;;  %2244 = vmatprep.subr.bf16.mxu1 %v3417_v40  ;;  %v3453_v39 = vld [vmem:[#allocation7 + $0x26c] ss:$16 sps:$4 sm:$0xff]   ;;  %v3448_v40 = vld [vmem:[#allocation7 + $0x260] ss:$16 sps:$4 sm:$0xff]  }
 0x11d   :  { %2159 = vmatpush1.bf16.msra.mxu0 %v3412_v41  ;;  %2245 = vmatpush1.bf16.msra.mxu1 %v3415_v42  ;;  %v3451_v41 = vld [vmem:[#allocation7 + $0x268] ss:$16 sps:$4 sm:$0xff]   ;;  %v3456_v42 = vld [vmem:[#allocation7 + $0x284] ss:$16 sps:$4 sm:$0xff]  }
 0x11e   :  { %2160 = vmatprep.subr.bf16.mxu0 %v3420_v43  ;;  %2246 = vmatprep.subr.bf16.mxu1 %v3423_v44  ;;  %v3459_v43 = vld [vmem:[#allocation7 + $0x28c] ss:$16 sps:$4 sm:$0xff]   ;;  %v3454_v44 = vld [vmem:[#allocation7 + $0x280] ss:$16 sps:$4 sm:$0xff]  }
 0x121   :  { %2161 = vmatpush1.bf16.msra.mxu0 %v3418_v45  ;;  %2247 = vmatpush1.bf16.msra.mxu1 %v3421_v46  ;;  %v3457_v45 = vld [vmem:[#allocation7 + $0x288] ss:$16 sps:$4 sm:$0xff]   ;;  %v3462_v46 = vld [vmem:[#allocation7 + $0x2a4] ss:$16 sps:$4 sm:$0xff]  }
 0x122   :  { %2162 = vmatprep.subr.bf16.mxu0 %v3426_v47  ;;  %2248 = vmatprep.subr.bf16.mxu1 %v3429_v48  ;;  %v3465_v47 = vld [vmem:[#allocation7 + $0x2ac] ss:$16 sps:$4 sm:$0xff]   ;;  %v3460_v48 = vld [vmem:[#allocation7 + $0x2a0] ss:$16 sps:$4 sm:$0xff]  }
 0x125   :  { %2163 = vmatpush1.bf16.msra.mxu0 %v3424_v49  ;;  %2249 = vmatpush1.bf16.msra.mxu1 %v3427_v50  ;;  %v3463_v49 = vld [vmem:[#allocation7 + $0x2a8] ss:$16 sps:$4 sm:$0xff]   ;;  %v3468_v50 = vld [vmem:[#allocation7 + $0x2c4] ss:$16 sps:$4 sm:$0xff]  }
 0x126   :  { %2175 = vmatprep.subr.bf16.mxu0 %v3432_v51  ;;  %2261 = vmatprep.subr.bf16.mxu1 %v3435_v52  ;;  %v3471_v51 = vld [vmem:[#allocation7 + $0x2cc] ss:$16 sps:$4 sm:$0xff]   ;;  %v3466_v52 = vld [vmem:[#allocation7 + $0x2c0] ss:$16 sps:$4 sm:$0xff]  }
 0x1bb   :  { %v1192_v0 = vpop.f32.mrb[0].mxu0  ;;  %v1321_v1 = vpop.f32.mrb[0].mxu1 }
 0x1bc   :  { %v3045_v2 = vadd.f32 %v1192_v0, %v259_v60  ;;  %v3049_v3 = vadd.f32 %v1321_v1, %v267_v61  ;;  %v1194_v4 = vpop.f32.mrb[1].mxu0  ;;  %v1323_v5 = vpop.f32.mrb[1].mxu1  ;;  %v3483_v0 = vld [vmem:[#allocation7 + $0x30c] ss:$16 sps:$4 sm:$0xff]   ;;  %v3478_v1 = vld [vmem:[#allocation7 + $0x300] ss:$16 sps:$4 sm:$0xff]  }
 0x1bd   :  { %v3046_v6 = vadd.f32 %v1194_v4, %v263_v62  ;;  %v3050_v7 = vadd.f32 %v1323_v5, %v271_v63  ;;  %v1196_v8 = vpop.f32.mrb[2].mxu0  ;;  %v1325_v9 = vpop.f32.mrb[2].mxu1  ;;  %v3489_v4 = vld [vmem:[#allocation7 + $0x32c] ss:$16 sps:$4 sm:$0xff]   ;;  %v3484_v5 = vld [vmem:[#allocation7 + $0x320] ss:$16 sps:$4 sm:$0xff]  }
 0x1be   :  { %v3047_v10 = vadd.f32 %v1196_v8, %v259_v60  ;;  %v3051_v11 = vadd.f32 %v1325_v9, %v267_v61  ;;  %v1198_v12 = vpop.f32.mrb[3].mxu0  ;;  %v1327_v13 = vpop.f32.mrb[3].mxu1  ;;  %v1330_v16 = vmax.f32 %v3045_v2, 0.0  ;;  %v1332_v17 = vmax.f32 %v3049_v3, 0.0  ;;  %v3477_v60 = vld [vmem:[#allocation7 + $0x2ec] ss:$16 sps:$4 sm:$0xff]  }
 0x1bf   :  { %v3048_v14 = vadd.f32 %v1198_v12, %v263_v62  ;;  %v3052_v15 = vadd.f32 %v1327_v13, %v271_v63  ;;  %v1331_v20 = vmax.f32 %v3046_v6, 0.0  ;;  %v1333_v21 = vmax.f32 %v3050_v7, 0.0  ;;  %v3472_v61 = vld [vmem:[#allocation7 + $0x2e0] ss:$16 sps:$4 sm:$0xff]   ;;  %v3475_v62 = vld [vmem:[#allocation7 + $0x2e8] ss:$16 sps:$4 sm:$0xff]  }
 0x1c0   :  { %v1334_v18 = vmax.f32 %v3047_v10, 0.0  ;;  %v1336_v19 = vmax.f32 %v3051_v11, 0.0  ;;  %v3480_v63 = vld [vmem:[#allocation7 + $0x304] ss:$16 sps:$4 sm:$0xff]   ;;  %v3481_v2 = vld [vmem:[#allocation7 + $0x308] ss:$16 sps:$4 sm:$0xff]  }
 0x1c1   :  { %v1335_v22 = vmax.f32 %v3048_v14, 0.0  ;;  %v1337_v23 = vmax.f32 %v3052_v15, 0.0  ;;  %v3486_v3 = vld [vmem:[#allocation7 + $0x324] ss:$16 sps:$4 sm:$0xff]   ;;  %v3487_v6 = vld [vmem:[#allocation7 + $0x328] ss:$16 sps:$4 sm:$0xff]  }
 0x1c2   :  { %v1338_v24 = vpack.c.bf16 %v1334_v18, %v1330_v16  ;;  %v3809_v25 = vpack.c.bf16 %v1336_v19, %v1332_v17  ;;  %v3492_v7 = vld [vmem:[#allocation7 + $0x344] ss:$16 sps:$4 sm:$0xff]   ;;  %v3495_v8 = vld [vmem:[#allocation7 + $0x34c] ss:$16 sps:$4 sm:$0xff]   ;;  %v3490_v9 = vld [vmem:[#allocation7 + $0x340] ss:$16 sps:$4 sm:$0xff]  }
 0x1c3   :  { %v1339_v26 = vpack.c.bf16 %v1335_v22, %v1331_v20  ;;  %v1341_v27 = vpack.c.bf16 %v1337_v23, %v1333_v21  ;;  %v3493_v10 = vld [vmem:[#allocation7 + $0x348] ss:$16 sps:$4 sm:$0xff]   ;;  %v3498_v11 = vld [vmem:[#allocation7 + $0x364] ss:$16 sps:$4 sm:$0xff]   ;;  %v3501_v12 = vld [vmem:[#allocation7 + $0x36c] ss:$16 sps:$4 sm:$0xff]  }
 0x1c4   :  { %v3496_v13 = vld [vmem:[#allocation7 + $0x360] ss:$16 sps:$4 sm:$0xff]   ;;  %v3499_v14 = vld [vmem:[#allocation7 + $0x368] ss:$16 sps:$4 sm:$0xff]   ;;  %v3504_v15 = vld [vmem:[#allocation7 + $0x384] ss:$16 sps:$4 sm:$0xff]  }
 0x1c5   :  { %2164 = vmatprep.mubr.bf16.mxu0 %v1339_v26  ;;  %2250 = vmatprep.mubr.bf16.mxu1 %v1339_v26  ;;  %v3507_v16 = vld [vmem:[#allocation7 + $0x38c] ss:$16 sps:$4 sm:$0xff]   ;;  %v3502_v17 = vld [vmem:[#allocation7 + $0x380] ss:$16 sps:$4 sm:$0xff]   ;;  %v3505_v18 = vld [vmem:[#allocation7 + $0x388] ss:$16 sps:$4 sm:$0xff]  }
 0x1c6   :  { %2165 = vmatmul.mubr.bf16.vlgmr.msra.gmra.mrb[4].mxu0 %v1338_v24  ;;  %2251 = vmatmul.mubr.bf16.vlgmr.msra.gmra.mrb[4].mxu1 %v1338_v24  ;;  %v3510_v19 = vld [vmem:[#allocation7 + $0x3a4] ss:$16 sps:$4 sm:$0xff]   ;;  %v3513_v20 = vld [vmem:[#allocation7 + $0x3ac] ss:$16 sps:$4 sm:$0xff]   ;;  %v3508_v21 = vld [vmem:[#allocation7 + $0x3a0] ss:$16 sps:$4 sm:$0xff]  }
 0x1c7   :  { %2176 = vmatpush1.bf16.msra.mxu0 %v3430_v28  ;;  %2262 = vmatpush1.bf16.msra.mxu1 %v3433_v29  ;;  %v3511_v22 = vld [vmem:[#allocation7 + $0x3a8] ss:$16 sps:$4 sm:$0xff]   ;;  %v3516_v23 = vld [vmem:[#allocation7 + $0x3c4] ss:$16 sps:$4 sm:$0xff]   ;;  %v3519_v24 = vld [vmem:[#allocation7 + $0x3cc] ss:$16 sps:$4 sm:$0xff]  }
 0x1c8   :  { %2207 = vmatprep.mubr.bf16.mxu0 %v1341_v27  ;;  %2293 = vmatprep.mubr.bf16.mxu1 %v1341_v27  ;;  %v3514_v26 = vld [vmem:[#allocation7 + $0x3c0] ss:$16 sps:$4 sm:$0xff]   ;;  %v3517_v27 = vld [vmem:[#allocation7 + $0x3c8] ss:$16 sps:$4 sm:$0xff]   ;;  %v3522_v28 = vld [vmem:[#allocation7 + $0x3e4] ss:$16 sps:$4 sm:$0xff]  }
 0x1c9   :  { %2177 = vmatprep.subr.bf16.mxu0 %v3438_v30  ;;  %2263 = vmatprep.subr.bf16.mxu1 %v3441_v31  ;;  %v3525_v29 = vld [vmem:[#allocation7 + $0x3ec] ss:$16 sps:$4 sm:$0xff]   ;;  %v3520_v30 = vld [vmem:[#allocation7 + $0x3e0] ss:$16 sps:$4 sm:$0xff]   ;;  %v3523_v31 = vld [vmem:[#allocation7 + $0x3e8] ss:$16 sps:$4 sm:$0xff]  }
 0x1cb   :  { %2178 = vmatpush1.bf16.msra.mxu0 %v3436_v32  ;;  %2264 = vmatpush1.bf16.msra.mxu1 %v3439_v33  ;;  %v3526_v32 = vld [vmem:[#allocation8 + $0x40] sm:$0xff]  }
 0x1cc   :  { %2179 = vmatprep.subr.bf16.mxu0 %v3444_v34  ;;  %2265 = vmatprep.subr.bf16.mxu1 %v3447_v35  ;;  %v3527_v33 = vld [vmem:[#allocation8 + $0xc0] sm:$0xff]  }
 0x1cd   :  { %v3528_v34 = vld [vmem:[#allocation8] sm:$0xff]  }
 0x1ce   :  { %v3529_v35 = vld [vmem:[#allocation8 + $0x80] sm:$0xff]  }
 0x1cf   :  { %2180 = vmatpush1.bf16.msra.mxu0 %v3442_v36  ;;  %2266 = vmatpush1.bf16.msra.mxu1 %v3445_v37  ;;  %v3530_v36 = vld [vmem:[#allocation8 + $0x48] sm:$0xff]  }
 0x1d0   :  { %2181 = vmatprep.subr.bf16.mxu0 %v3450_v38  ;;  %2267 = vmatprep.subr.bf16.mxu1 %v3453_v39  ;;  %v3531_v37 = vld [vmem:[#allocation8 + $0xc8] sm:$0xff]  }
 0x1d1   :  { %v3532_v38 = vld [vmem:[#allocation8 + $0x8] sm:$0xff]  }
 0x1d2   :  { %v3533_v39 = vld [vmem:[#allocation8 + $0x88] sm:$0xff]  }
 0x1d3   :  { %2182 = vmatpush1.bf16.msra.mxu0 %v3448_v40  ;;  %2268 = vmatpush1.bf16.msra.mxu1 %v3451_v41  ;;  %v3534_v40 = vld [vmem:[#allocation8 + $0x50] sm:$0xff]  }
 0x1d4   :  { %2183 = vmatprep.subr.bf16.mxu0 %v3456_v42  ;;  %2269 = vmatprep.subr.bf16.mxu1 %v3459_v43  ;;  %v3535_v41 = vld [vmem:[#allocation8 + $0xd0] sm:$0xff]  }
 0x1d5   :  { %v3536_v42 = vld [vmem:[#allocation8 + $0x10] sm:$0xff]  }
 0x1d6   :  { %v3537_v43 = vld [vmem:[#allocation8 + $0x90] sm:$0xff]  }
 0x1d7   :  { %2184 = vmatpush1.bf16.msra.mxu0 %v3454_v44  ;;  %2270 = vmatpush1.bf16.msra.mxu1 %v3457_v45  ;;  %v3538_v44 = vld [vmem:[#allocation8 + $0x58] sm:$0xff]  }
 0x1d8   :  { %2185 = vmatprep.subr.bf16.mxu0 %v3462_v46  ;;  %2271 = vmatprep.subr.bf16.mxu1 %v3465_v47  ;;  %v3539_v45 = vld [vmem:[#allocation8 + $0xd8] sm:$0xff]   ;;  %v3542_v47 = vld [vmem:[#allocation8 + $0x60] sm:$0xff]  }
 0x1d9   :  { %v3540_v46 = vld [vmem:[#allocation8 + $0x18] sm:$0xff]  }
 0x1db   :  { %2186 = vmatpush1.bf16.msra.mxu0 %v3460_v48  ;;  %2272 = vmatpush1.bf16.msra.mxu1 %v3463_v49  ;;  %v3543_v48 = vld [vmem:[#allocation8 + $0xe0] sm:$0xff]  }
 0x1dc   :  { %2187 = vmatprep.subr.bf16.mxu0 %v3468_v50  ;;  %2273 = vmatprep.subr.bf16.mxu1 %v3471_v51  ;;  %v3544_v49 = vld [vmem:[#allocation8 + $0x20] sm:$0xff]   ;;  %v3546_v51 = vld [vmem:[#allocation8 + $0x68] sm:$0xff]  }
 0x1dd   :  { %v3545_v50 = vld [vmem:[#allocation8 + $0xa0] sm:$0xff]  }
 0x1df   :  { %2188 = vmatpush1.bf16.msra.mxu0 %v3466_v52  ;;  %2274 = vmatpush1.bf16.msra.mxu1 %v3469_v53  ;;  %v3547_v52 = vld [vmem:[#allocation8 + $0xe8] sm:$0xff]  }
 0x1e0   :  { %2189 = vmatprep.subr.bf16.mxu0 %v3474_v57  ;;  %2275 = vmatprep.subr.bf16.mxu1 %v3477_v60  ;;  %v3548_v53 = vld [vmem:[#allocation8 + $0x28] sm:$0xff]   ;;  %v3550_v60 = vld [vmem:[#allocation8 + $0x70] sm:$0xff]  }
 0x1e1   :  { %v3549_v57 = vld [vmem:[#allocation8 + $0xa8] sm:$0xff]  }
 0x1e3   :  { %2190 = vmatpush1.bf16.msra.mxu0 %v3472_v61  ;;  %2276 = vmatpush1.bf16.msra.mxu1 %v3475_v62  ;;  %v3551_v61 = vld [vmem:[#allocation8 + $0xf0] sm:$0xff]  }
 0x1e4   :  { %2191 = vmatprep.subr.bf16.mxu0 %v3480_v63  ;;  %2277 = vmatprep.subr.bf16.mxu1 %v3483_v0  ;;  %v3552_v62 = vld [vmem:[#allocation8 + $0x30] sm:$0xff]   ;;  %v3554_v0 = vld [vmem:[#allocation8 + $0x78] sm:$0xff]  }
 0x1e5   :  { %v3553_v63 = vld [vmem:[#allocation8 + $0xb0] sm:$0xff]  }
 0x1e7   :  { %2192 = vmatpush1.bf16.msra.mxu0 %v3478_v1  ;;  %2278 = vmatpush1.bf16.msra.mxu1 %v3481_v2  ;;  %v3555_v1 = vld [vmem:[#allocation8 + $0xf8] sm:$0xff]  }
 0x1e8   :  { %2193 = vmatprep.subr.bf16.mxu0 %v3486_v3  ;;  %2279 = vmatprep.subr.bf16.mxu1 %v3489_v4  ;;  %v3556_v2 = vld [vmem:[#allocation8 + $0x38] sm:$0xff]   ;;  %v1470_v4 = vld [vmem:[%s3843_s4] sm:$0xf] }
 0x1e9   :  { %v3557_v3 = vld [vmem:[#allocation8 + $0xb8] sm:$0xff]  }
 0x1eb   :  { %2194 = vmatpush1.bf16.msra.mxu0 %v3484_v5  ;;  %2280 = vmatpush1.bf16.msra.mxu1 %v3487_v6  ;;  %v1475_v5 = vrot.slane %v1470_v4, %v258_v55  ;;  %v1483_v6 = vrot.slane %v1470_v4, %v266_v56 }
 0x1ec   :  { %2195 = vmatprep.subr.bf16.mxu0 %v3492_v7  ;;  %2281 = vmatprep.subr.bf16.mxu1 %v3495_v8  ;;  %v1479_v7 = vrot.slane %v1470_v4, %v262_v58  ;;  %v1487_v8 = vrot.slane %v1470_v4, %v270_v59 }
 0x1ef   :  { %2196 = vmatpush1.bf16.msra.mxu0 %v3490_v9  ;;  %2282 = vmatpush1.bf16.msra.mxu1 %v3493_v10 }
 0x1f0   :  { %2197 = vmatprep.subr.bf16.mxu0 %v3498_v11  ;;  %2283 = vmatprep.subr.bf16.mxu1 %v3501_v12 }
 0x1f3   :  { %2198 = vmatpush1.bf16.msra.mxu0 %v3496_v13  ;;  %2284 = vmatpush1.bf16.msra.mxu1 %v3499_v14 }
 0x1f4   :  { %2199 = vmatprep.subr.bf16.mxu0 %v3504_v15  ;;  %2285 = vmatprep.subr.bf16.mxu1 %v3507_v16 }
 0x1f7   :  { %2200 = vmatpush1.bf16.msra.mxu0 %v3502_v17  ;;  %2286 = vmatpush1.bf16.msra.mxu1 %v3505_v18 }
 0x1f8   :  { %2201 = vmatprep.subr.bf16.mxu0 %v3510_v19  ;;  %2287 = vmatprep.subr.bf16.mxu1 %v3513_v20 }
 0x1fb   :  { %2202 = vmatpush1.bf16.msra.mxu0 %v3508_v21  ;;  %2288 = vmatpush1.bf16.msra.mxu1 %v3511_v22 }
 0x1fc   :  { %2203 = vmatprep.subr.bf16.mxu0 %v3516_v23  ;;  %2289 = vmatprep.subr.bf16.mxu1 %v3519_v24 }
 0x1ff   :  { %2204 = vmatpush1.bf16.msra.mxu0 %v3514_v26  ;;  %2290 = vmatpush1.bf16.msra.mxu1 %v3517_v27 }
 0x200   :  { %2205 = vmatprep.subr.bf16.mxu0 %v3522_v28  ;;  %2291 = vmatprep.subr.bf16.mxu1 %v3525_v29 }
 0x203   :  { %2206 = vmatpush1.bf16.msra.mxu0 %v3520_v30  ;;  %2292 = vmatpush1.bf16.msra.mxu1 %v3523_v31 }
 0x204   :  { %3001 = vmatprep.subr.bf16.mxu0 %v3526_v32  ;;  %3023 = vmatprep.subr.bf16.mxu1 %v3527_v33 }
 0x206   :  { %2208 = vmatmul.mubr.bf16.vlgmr.msra.gmra.mrb[4].mxu0 %v3809_v25  ;;  %2294 = vmatmul.mubr.bf16.vlgmr.msra.gmra.mrb[4].mxu1 %v3809_v25  ;;  %v3541_v25 = vld [vmem:[#allocation8 + $0x98] sm:$0xff]  }
 0x207   :  { %3002 = vmatpush3.bf16.msra.mxu0 %v3528_v34  ;;  %3024 = vmatpush3.bf16.msra.mxu1 %v3529_v35  ;;  %v2968_v35 = vld [vmem:[%s3845_s6] ss:$0 sm:$0xff]  ;;  %s3646_s6 = scalar_lea.vmem %s2669_s9, 256 }
 0x208   :  { %3003 = vmatprep.subr.bf16.mxu0 %v3530_v36  ;;  %3025 = vmatprep.subr.bf16.mxu1 %v3531_v37  ;;  %p3647_p4 = scmp.ne.s32.totalorder %s2669_s9, %s3646_s6  ;;  %p3652_p6 = scmp.lt.s32.totalorder %s3646_s6, %s3646_s6 }
 0x20a   :  { %p3653_p7 = por %p3652_p6, %p3651_p5 }
 0x20b   :  { %3004 = vmatpush3.bf16.msra.mxu0 %v3532_v38  ;;  %3026 = vmatpush3.bf16.msra.mxu1 %v3533_v39 }
 0x20c   :  { %3005 = vmatprep.subr.bf16.mxu0 %v3534_v40  ;;  %3027 = vmatprep.subr.bf16.mxu1 %v3535_v41  ;;  %p3654_p8 = pnand %p3653_p7, %p3647_p4 }
 0x20f   :  { %3006 = vmatpush3.bf16.msra.mxu0 %v3536_v42  ;;  %3028 = vmatpush3.bf16.msra.mxu1 %v3537_v43 }
 0x210   :  { %3007 = vmatprep.subr.bf16.mxu0 %v3538_v44  ;;  %3029 = vmatprep.subr.bf16.mxu1 %v3539_v45 }
 0x213   :  { %3008 = vmatpush3.bf16.msra.mxu0 %v3540_v46  ;;  %3030 = vmatpush3.bf16.msra.mxu1 %v3541_v25 }
 0x214   :  { %3009 = vmatprep.subr.bf16.mxu0 %v3542_v47  ;;  %3031 = vmatprep.subr.bf16.mxu1 %v3543_v48 }
 0x217   :  { %3010 = vmatpush3.bf16.msra.mxu0 %v3544_v49  ;;  %3032 = vmatpush3.bf16.msra.mxu1 %v3545_v50 }
 0x218   :  { %3011 = vmatprep.subr.bf16.mxu0 %v3546_v51  ;;  %3033 = vmatprep.subr.bf16.mxu1 %v3547_v52 }
 0x21b   :  { %3012 = vmatpush3.bf16.msra.mxu0 %v3548_v53  ;;  %3034 = vmatpush3.bf16.msra.mxu1 %v3549_v57 }
 0x21c   :  { %3013 = vmatprep.subr.bf16.mxu0 %v3550_v60  ;;  %3035 = vmatprep.subr.bf16.mxu1 %v3551_v61 }
 0x21f   :  { %3014 = vmatpush3.bf16.msra.mxu0 %v3552_v62  ;;  %3036 = vmatpush3.bf16.msra.mxu1 %v3553_v63 }
 0x220   :  { %3015 = vmatprep.subr.bf16.mxu0 %v3554_v0  ;;  %3037 = vmatprep.subr.bf16.mxu1 %v3555_v1 }
 0x223   :  { %3016 = vmatpush3.bf16.msra.mxu0 %v3556_v2  ;;  %3038 = vmatpush3.bf16.msra.mxu1 %v3557_v3 }
 0x2d9   :  { %v2209_v9 = vpop.f32.mrb[4].mxu0  ;;  %v2295_v10 = vpop.f32.mrb[4].mxu1 }
 0x2da   :  { %v3053_v11 = vadd.f32 %v2209_v9, %v1475_v5  ;;  %v3057_v12 = vadd.f32 %v2295_v10, %v1483_v6  ;;  %v2211_v13 = vpop.f32.mrb[5].mxu0  ;;  %v2297_v14 = vpop.f32.mrb[5].mxu1 }
 0x2db   :  { %v3054_v15 = vadd.f32 %v2211_v13, %v1479_v7  ;;  %v3058_v16 = vadd.f32 %v2297_v14, %v1487_v8  ;;  %v2213_v17 = vpop.f32.mrb[6].mxu0  ;;  %v2299_v18 = vpop.f32.mrb[6].mxu1 }
 0x2dc   :  { %v3055_v55 = vadd.f32 %v2213_v17, %v1475_v5  ;;  %v3059_v19 = vadd.f32 %v2299_v18, %v1483_v6  ;;  %v2215_v20 = vpop.f32.mrb[7].mxu0  ;;  %v2301_v56 = vpop.f32.mrb[7].mxu1  ;;  %v2304_v58 = vmax.f32 %v3053_v11, 0.0  ;;  %v2306_v23 = vmax.f32 %v3057_v12, 0.0 }
 0x2dd   :  { %v3056_v21 = vadd.f32 %v2215_v20, %v1479_v7  ;;  %v3060_v22 = vadd.f32 %v2301_v56, %v1487_v8  ;;  %v2305_v24 = vmax.f32 %v3054_v15, 0.0  ;;  %v2307_v26 = vmax.f32 %v3058_v16, 0.0 }
 0x2de   :  { %v2308_v54 = vmax.f32 %v3055_v55, 0.0  ;;  %v2310_v59 = vmax.f32 %v3059_v19, 0.0 }
 0x2df   :  { %v2309_v27 = vmax.f32 %v3056_v21, 0.0  ;;  %v2311_v28 = vmax.f32 %v3060_v22, 0.0 }
 0x2e0   :  { %v2312_v29 = vpack.c.bf16 %v2308_v54, %v2304_v58  ;;  %v2314_v30 = vpack.c.bf16 %v2310_v59, %v2306_v23 }
 0x2e1   :  { %v2313_v31 = vpack.c.bf16 %v2309_v27, %v2305_v24  ;;  %v2315_v32 = vpack.c.bf16 %v2311_v28, %v2307_v26 }
 0x2e3   :  { %2611 = vmatprep.mubr.bf16.mxu0 %v2313_v31  ;;  %2652 = vmatprep.mubr.bf16.mxu1 %v2315_v32 }
 0x2e4   :  { %2612 = vmatmul.mubr.bf16.vlgmr.msra.gmra.mrb[8].mxu0 %v2312_v29  ;;  %2653 = vmatmul.mubr.bf16.vlgmr.msra.gmra.mrb[8].mxu1 %v2314_v30 }
 0x3b7   :  { %v3017_v33 = vpop.f32.mrb[8].mxu0  ;;  %v3039_v34 = vpop.f32.mrb[8].mxu1 }
 0x3b8   :  { %v3018_v36 = vpop.f32.mrb[9].mxu0  ;;  %v3040_v37 = vpop.f32.mrb[9].mxu1 }
 0x3b9   :  { %v3019_v38 = vadd.f32 %v3018_v36, %v3017_v33  ;;  %v3041_v39 = vadd.f32 %v3040_v37, %v3039_v34  ;;  %v3020_v40 = vpop.f32.mrb[10].mxu0  ;;  %v3042_v41 = vpop.f32.mrb[10].mxu1 }
 0x3ba   :  { %v3021_v42 = vpop.f32.mrb[11].mxu0  ;;  %v3043_v43 = vpop.f32.mrb[11].mxu1 }
 0x3bb   :  { %v2614_v44 = vadd.f32 %v3019_v38, %v2968_v35  ;;  %v3022_v45 = vadd.f32 %v3021_v42, %v3020_v40  ;;  %v3044_v46 = vadd.f32 %v3043_v43, %v3042_v41 }
 0x3bd   :  { %v2655_v25 = vadd.f32 %v3041_v39, %v2614_v44  ;;  %v2617_v47 = vadd.f32 %v3022_v45, %v2968_v35 }
 0x3bf   :  { %2661 = vst [vmem:[#allocation10] sm:$0xff] %v2655_v25  ;;  %v2658_v48 = vadd.f32 %v3044_v46, %v2617_v47 }
 0x3c1   :  { %2662 = vst [vmem:[#allocation10 + $0x8] sm:$0xff] %v2658_v48 }
 0x3c2   :  { %3657 = shalt.err (!%p3654_p8)
}
 0x3c3   :  { %s3658_s14 = scalar_lea.hbm %s3846_s7, 256 }
 0x3c4   :  { %p3659_p9 = scmp.ne.s32.totalorder %s3846_s7, %s3658_s14  ;;  %p3662_p10 = scmp.lt.u32.totalorder %s3658_s14, %s3846_s7 }
 0x3c6   :  { %p3664_p11 = pnand %p3662_p10, %p3659_p9 }
 0x3c8   :  { %3667 = shalt.err (!%p3664_p11)
}
 0x3c9   :  { %s3689_s16 = smov 128   ;;  %s3690_s19 = smov 8  }
 0x3ca   :  { %2674 = dma.vmem_to_hbm [thread:$0]  %s2669_s9, 256, %s3846_s7, [#allocation4], %s3689_s16, %s3689_s16, %s3690_s19  }
 0x3cb   :  { %3674 = dma.done.wait [#allocation4], 256  }
 0x3cc   :  { %3675 = vsyncadd [#allocation4], 4294967040 }
 0x3cd   :  { %2678 = vsyncpa [#allocation3], 1 }
 0x3ce   :  { %2679 = vsyncpa [#allocation6], 1 }
 0x3cf   :  { %2680 = vsyncpa [#allocation9], 1 }
 0x3d0   :  { %2681 = vsyncpa [#allocation4], 1 }

</bundles_post_ra>
